<compile_context>
chip_gen: v5e
topology: v5e:2x2
jax: 0.10.0
libtpu: 0.0.40
codegen_flags: <defaults>
</compile_context>

<pallas_src>
import functools
import math

import jax
import jax.numpy as jnp
import numpy as np
from jax.experimental import pallas as pl
from jax.experimental.pallas import tpu as pltpu

LN_EPS = 1e-5       # nn.LayerNorm default eps
NEG_INF = -1e6      # matches torch.full((T, T), -1000000.0) causal mask


def _layernorm(x, g, b):
    mu = jnp.mean(x, axis=-1, keepdims=True)
    var = jnp.mean((x - mu) ** 2, axis=-1, keepdims=True)
    return (x - mu) * jax.lax.rsqrt(var + LN_EPS) * g + b


def transformer_layer_kernel(
    x_ref, ln1_g_ref, ln1_b_ref,
    wq_ref, wk_ref, wv_ref, bq_ref, bk_ref, bv_ref,
    wout_ref, bout_ref,
    ln2_g_ref, ln2_b_ref, w1_ref, b1_ref, w2_ref, b2_ref,
    o_ref, *, num_head, d_head,
):
    xf = x_ref[0].astype(jnp.float32)            # [T, D] tokens of this batch element
    T, D = xf.shape
    scale = 1.0 / math.sqrt(d_head)

    # ---------------- sublayer 1: pre-LN causal multi-head attention ----------------
    h = _layernorm(xf, ln1_g_ref[...], ln1_b_ref[...])
    h_b = h.astype(jnp.bfloat16)                 # bf16 MXU operands, f32 accumulation

    # Head-major projections via weight layout ([H, D, dh]); major-axis head index,
    # plain 2-D MXU matmuls, major-axis stack — no sub-128-lane activation slicing.
    qh = jnp.stack([jnp.dot(h_b, wq_ref[i], preferred_element_type=jnp.float32)
                    for i in range(num_head)], axis=0) + bq_ref[...]
    kh = jnp.stack([jnp.dot(h_b, wk_ref[i], preferred_element_type=jnp.float32)
                    for i in range(num_head)], axis=0) + bk_ref[...]
    vh = jnp.stack([jnp.dot(h_b, wv_ref[i], preferred_element_type=jnp.float32)
                    for i in range(num_head)], axis=0) + bv_ref[...]

    # Causal mask built in-kernel (VPU compare/select; no HBM bias input).
    row = jax.lax.broadcasted_iota(jnp.int32, (T, T), 0)
    col = jax.lax.broadcasted_iota(jnp.int32, (T, T), 1)
    causal = jnp.where(col <= row, 0.0, NEG_INF).astype(jnp.float32)

    # Per-batch, per-head scores [H, T, T]; softmax kept in f32.
    # TODO(synk): at production T, flash-tile the key axis (online softmax with running
    # max/denominator accumulators) and tile the query axis as an extra parallel grid
    # dim so live attention state is H*tq*tk rather than H*T*T.
    s = jnp.einsum("htf,hsf->hts",
                   qh.astype(jnp.bfloat16), kh.astype(jnp.bfloat16),
                   preferred_element_type=jnp.float32) * scale
    s = s + causal[None, :, :]
    s = s - jnp.max(s, axis=-1, keepdims=True)
    p = jnp.exp(s)
    p = p / jnp.sum(p, axis=-1, keepdims=True)   # exact reciprocal (accuracy note in review)
    oh = jnp.einsum("hts,hsf->htf",
                    p.astype(jnp.bfloat16), vh.astype(jnp.bfloat16),
                    preferred_element_type=jnp.float32)          # [H, T, dh]

    # Head merge folded into the output projection: sum_h oh[h] @ wout[h]
    # (no scratch buffer, no lane-offset masked stores, no lane concat).
    attn = bout_ref[...].astype(jnp.float32)
    for i in range(num_head):
        attn = attn + jnp.dot(oh[i].astype(jnp.bfloat16), wout_ref[i],
                              preferred_element_type=jnp.float32)
    x1 = xf + attn                               # dropout p = 0.0 -> identity

    # ---------------- sublayer 2: pre-LN feed-forward ----------------
    h2 = _layernorm(x1, ln2_g_ref[...], ln2_b_ref[...])
    f = jnp.dot(h2.astype(jnp.bfloat16), w1_ref[...],
                preferred_element_type=jnp.float32) + b1_ref[...]
    f = jnp.maximum(f, 0.0)                      # relu
    f = jnp.dot(f.astype(jnp.bfloat16), w2_ref[...],
                preferred_element_type=jnp.float32) + b2_ref[...]
    o_ref[0] = (x1 + f).astype(o_ref.dtype)


def prepare_params(params, num_head):
    """One-time re-layout/cast of PyTorch-convention weights into the layouts the
    kernel consumes (done outside the per-call path: no .T per forward)."""
    D = params["ln1_g"].shape[0]
    dh = D // num_head
    wdt = jnp.bfloat16
    wqkv = params["wqkv"].reshape(3, num_head, dh, D)       # rows ordered (k, h, d)
    bqkv = params["bqkv"].reshape(3, num_head, 1, dh)
    return dict(
        ln1_g=params["ln1_g"][None, :], ln1_b=params["ln1_b"][None, :],
        wq=jnp.transpose(wqkv[0], (0, 2, 1)).astype(wdt),   # [H, D, dh]
        wk=jnp.transpose(wqkv[1], (0, 2, 1)).astype(wdt),
        wv=jnp.transpose(wqkv[2], (0, 2, 1)).astype(wdt),
        bq=bqkv[0].astype(jnp.float32),                      # [H, 1, dh]
        bk=bqkv[1].astype(jnp.float32),
        bv=bqkv[2].astype(jnp.float32),
        wout=params["wout"].T.reshape(num_head, dh, D).astype(wdt),  # [H, dh, D]
        bout=params["bout"][None, :],
        ln2_g=params["ln2_g"][None, :], ln2_b=params["ln2_b"][None, :],
        w1=params["w1"].T.astype(wdt), b1=params["b1"][None, :],      # [D, F]
        w2=params["w2"].T.astype(wdt), b2=params["b2"][None, :],      # [F, D]
    )


def transformer_layer(x, prep, num_head):
    """x: [T, B, D] (same convention as the PyTorch module)."""
    T, B, D = x.shape
    d_head = D // num_head
    # Per-batch attention: batch is a grid axis, so the blocked axis must be major.
    x_btd = jnp.transpose(x, (1, 0, 2))                       # [B, T, D]

    def _rep(arr):                                            # whole-array, grid-invariant
        zeros = (0,) * arr.ndim
        return pl.BlockSpec(arr.shape, lambda b, _z=zeros: _z)

    weight_order = ("ln1_g", "ln1_b", "wq", "wk", "wv", "bq", "bk", "bv",
                    "wout", "bout", "ln2_g", "ln2_b", "w1", "b1", "w2", "b2")
    weights = [prep[k] for k in weight_order]

    out_btd = pl.pallas_call(
        functools.partial(transformer_layer_kernel, num_head=num_head, d_head=d_head),
        grid=(B,),
        in_specs=[pl.BlockSpec((1, T, D), lambda b: (b, 0, 0))]
                 + [_rep(w) for w in weights],
        out_specs=pl.BlockSpec((1, T, D), lambda b: (b, 0, 0)),
        out_shape=jax.ShapeDtypeStruct((B, T, D), x.dtype),
        compiler_params=pltpu.CompilerParams(
            # B >= 2 parallel blocks -> both v7x TensorCores; pipelined activation DMA.
            dimension_semantics=("parallel",),
            # Above the 16/32 MiB scoped defaults, below v7x's 64 MiB physical VMEM.
            vmem_limit_bytes=48 * 1024 * 1024,
        ),
    )(x_btd, *weights)
    return jnp.transpose(out_btd, (1, 0, 2))


def reference(x, params, num_head):
    """Pure-JAX f32 mirror of the PyTorch forward (dropout p=0, non-flash path)."""
    T, B, D = x.shape
    dh = D // num_head

    def ln(v, g, b):
        mu = v.mean(-1, keepdims=True)
        var = ((v - mu) ** 2).mean(-1, keepdims=True)
        return (v - mu) / jnp.sqrt(var + LN_EPS) * g + b

    h = ln(x, params["ln1_g"], params["ln1_b"])
    qkv = h @ params["wqkv"].T + params["bqkv"]              # [T, B, 3D]
    qkv = qkv.reshape(T, B, 3, num_head, dh)                 # 't b (k h d)'
    q = jnp.transpose(qkv[:, :, 0], (1, 2, 0, 3))            # [B, H, T, dh]
    k = jnp.transpose(qkv[:, :, 1], (1, 2, 0, 3))
    v = jnp.transpose(qkv[:, :, 2], (1, 2, 0, 3))
    s = jnp.einsum("bhtd,bhsd->bhts", q, k) / math.sqrt(dh)
    mask = jnp.triu(jnp.full((T, T), NEG_INF, jnp.float32), k=1)
    s = s + mask
    p = jax.nn.softmax(s, axis=-1)
    av = jnp.einsum("bhts,bhsd->bhtd", p, v)
    av = jnp.transpose(av, (2, 0, 1, 3)).reshape(T, B, D)    # 'b h t d -> t b (h d)'
    attn = av @ params["wout"].T + params["bout"]
    x1 = x + attn
    h2 = ln(x1, params["ln2_g"], params["ln2_b"])
    f = jax.nn.relu(h2 @ params["w1"].T + params["b1"]) @ params["w2"].T + params["b2"]
    return x1 + f


if __name__ == "__main__":
    # Small shapes consistent with the module: seq=8, batch=2, d_model=32,
    # num_head=4, ff_dim=64, dropout=0.0, flash=False math path.
    d_model, num_head, ff_dim = 32, 4, 64
    T, B = 8, 2

    key = jax.random.PRNGKey(0)
    keys = jax.random.split(key, 5)

    def init_linear(k, out_dim, in_dim):
        k1, k2 = jax.random.split(k)
        bound = 1.0 / math.sqrt(in_dim)
        w = jax.random.uniform(k1, (out_dim, in_dim), jnp.float32, -bound, bound)
        b = jax.random.uniform(k2, (out_dim,), jnp.float32, -bound, bound)
        return w, b

    wqkv, bqkv = init_linear(keys[0], 3 * d_model, d_model)
    wout, bout = init_linear(keys[1], d_model, d_model)
    w1, b1 = init_linear(keys[2], ff_dim, d_model)
    w2, b2 = init_linear(keys[3], d_model, ff_dim)

    params = dict(
        ln1_g=jnp.ones((d_model,), jnp.float32),
        ln1_b=jnp.zeros((d_model,), jnp.float32),
        wqkv=wqkv, bqkv=bqkv, wout=wout, bout=bout,
        ln2_g=jnp.ones((d_model,), jnp.float32),
        ln2_b=jnp.zeros((d_model,), jnp.float32),
        w1=w1, b1=b1, w2=w2, b2=b2,
    )

    x = jax.random.normal(keys[4], (T, B, d_model), jnp.float32)

    prep = prepare_params(params, num_head)            # one-time weight re-layout/cast
    out = jax.block_until_ready(transformer_layer(x, prep, num_head))
    ref = reference(x, params, num_head)
    # Tolerance loosened vs f32-exact: MXU operands (activations + weights) are bf16
    # with f32 accumulation per the perf review; LN/softmax/residual stay f32.
    np.testing.assert_allclose(np.asarray(out), np.asarray(ref), atol=3e-2, rtol=2e-2)
    # TODO(synk): stochastic dropout (p > 0) not implemented; forward matches p=0.0.
    print("KERNEL_OK")
</pallas_src>

<mosaic_0001>
module attributes {stable_mosaic.version = 11 : i64} {
  func.func @transformer_layer_kernel(%arg0: i32, %arg1: memref<1x8x32xf32, #tpu.memory_space<vmem>>, %arg2: memref<1x32xf32, #tpu.memory_space<vmem>>, %arg3: memref<1x32xf32, #tpu.memory_space<vmem>>, %arg4: memref<4x32x8xbf16, #tpu.memory_space<vmem>>, %arg5: memref<4x32x8xbf16, #tpu.memory_space<vmem>>, %arg6: memref<4x32x8xbf16, #tpu.memory_space<vmem>>, %arg7: memref<4x1x8xf32, #tpu.memory_space<vmem>>, %arg8: memref<4x1x8xf32, #tpu.memory_space<vmem>>, %arg9: memref<4x1x8xf32, #tpu.memory_space<vmem>>, %arg10: memref<4x8x32xbf16, #tpu.memory_space<vmem>>, %arg11: memref<1x32xf32, #tpu.memory_space<vmem>>, %arg12: memref<1x32xf32, #tpu.memory_space<vmem>>, %arg13: memref<1x32xf32, #tpu.memory_space<vmem>>, %arg14: memref<32x64xbf16, #tpu.memory_space<vmem>>, %arg15: memref<1x64xf32, #tpu.memory_space<vmem>>, %arg16: memref<64x32xbf16, #tpu.memory_space<vmem>>, %arg17: memref<1x32xf32, #tpu.memory_space<vmem>>, %arg18: memref<1x8x32xf32, #tpu.memory_space<vmem>>) attributes {dimension_semantics = [#tpu.dimension_semantics<parallel>], iteration_bounds = array<i64: 2>, scalar_prefetch = 0 : i64, scratch_operands = 0 : i64, tpu.core_type = #tpu.core_type<tc>, window_params = [{transform_indices = @transform_0, window_bounds = array<i64: 1, 8, 32>}, {pipeline_mode = #tpu.pipeline_mode<synchronous>, transform_indices = @transform_1, window_bounds = array<i64: 1, 32>}, {pipeline_mode = #tpu.pipeline_mode<synchronous>, transform_indices = @transform_2, window_bounds = array<i64: 1, 32>}, {pipeline_mode = #tpu.pipeline_mode<synchronous>, transform_indices = @transform_3, window_bounds = array<i64: 4, 32, 8>}, {pipeline_mode = #tpu.pipeline_mode<synchronous>, transform_indices = @transform_4, window_bounds = array<i64: 4, 32, 8>}, {pipeline_mode = #tpu.pipeline_mode<synchronous>, transform_indices = @transform_5, window_bounds = array<i64: 4, 32, 8>}, {pipeline_mode = #tpu.pipeline_mode<synchronous>, transform_indices = @transform_6, window_bounds = array<i64: 4, 1, 8>}, {pipeline_mode = #tpu.pipeline_mode<synchronous>, transform_indices = @transform_7, window_bounds = array<i64: 4, 1, 8>}, {pipeline_mode = #tpu.pipeline_mode<synchronous>, transform_indices = @transform_8, window_bounds = array<i64: 4, 1, 8>}, {pipeline_mode = #tpu.pipeline_mode<synchronous>, transform_indices = @transform_9, window_bounds = array<i64: 4, 8, 32>}, {pipeline_mode = #tpu.pipeline_mode<synchronous>, transform_indices = @transform_10, window_bounds = array<i64: 1, 32>}, {pipeline_mode = #tpu.pipeline_mode<synchronous>, transform_indices = @transform_11, window_bounds = array<i64: 1, 32>}, {pipeline_mode = #tpu.pipeline_mode<synchronous>, transform_indices = @transform_12, window_bounds = array<i64: 1, 32>}, {pipeline_mode = #tpu.pipeline_mode<synchronous>, transform_indices = @transform_13, window_bounds = array<i64: 32, 64>}, {pipeline_mode = #tpu.pipeline_mode<synchronous>, transform_indices = @transform_14, window_bounds = array<i64: 1, 64>}, {pipeline_mode = #tpu.pipeline_mode<synchronous>, transform_indices = @transform_15, window_bounds = array<i64: 64, 32>}, {pipeline_mode = #tpu.pipeline_mode<synchronous>, transform_indices = @transform_16, window_bounds = array<i64: 1, 32>}, {transform_indices = @transform_17, window_bounds = array<i64: 1, 8, 32>}]} {
    %c0 = arith.constant 0 : index
    %c0_0 = arith.constant 0 : index
    %c0_1 = arith.constant 0 : index
    %0 = vector.load %arg1[%c0, %c0_0, %c0_1] : memref<1x8x32xf32, #tpu.memory_space<vmem>>, vector<1x8x32xf32>
    %1 = vector.shape_cast %0 : vector<1x8x32xf32> to vector<8x32xf32>
    %c0_2 = arith.constant 0 : index
    %c0_3 = arith.constant 0 : index
    %2 = vector.load %arg2[%c0_2, %c0_3] : memref<1x32xf32, #tpu.memory_space<vmem>>, vector<1x32xf32>
    %c0_4 = arith.constant 0 : index
    %c0_5 = arith.constant 0 : index
    %3 = vector.load %arg3[%c0_4, %c0_5] : memref<1x32xf32, #tpu.memory_space<vmem>>, vector<1x32xf32>
    %cst = arith.constant dense<0.000000e+00> : vector<8xf32>
    %4 = vector.multi_reduction <add>, %1, %cst [1] : vector<8x32xf32> to vector<8xf32>
    %5 = vector.shape_cast %4 : vector<8xf32> to vector<8x1xf32>
    %cst_6 = arith.constant 3.200000e+01 : f32
    %6 = vector.broadcast %cst_6 : f32 to vector<8x1xf32>
    %7 = arith.divf %5, %6 : vector<8x1xf32>
    %8 = vector.broadcast %7 : vector<8x1xf32> to vector<8x32xf32>
    %9 = arith.subf %1, %8 : vector<8x32xf32>
    %10 = arith.mulf %9, %9 : vector<8x32xf32>
    %cst_7 = arith.constant dense<0.000000e+00> : vector<8xf32>
    %11 = vector.multi_reduction <add>, %10, %cst_7 [1] : vector<8x32xf32> to vector<8xf32>
    %12 = vector.shape_cast %11 : vector<8xf32> to vector<8x1xf32>
    %cst_8 = arith.constant 3.200000e+01 : f32
    %13 = vector.broadcast %cst_8 : f32 to vector<8x1xf32>
    %14 = arith.divf %12, %13 : vector<8x1xf32>
    %15 = vector.broadcast %7 : vector<8x1xf32> to vector<8x32xf32>
    %16 = arith.subf %1, %15 : vector<8x32xf32>
    %cst_9 = arith.constant 9.99999974E-6 : f32
    %17 = vector.broadcast %cst_9 : f32 to vector<8x1xf32>
    %18 = arith.addf %14, %17 : vector<8x1xf32>
    %19 = math.rsqrt %18 : vector<8x1xf32>
    %20 = vector.broadcast %19 : vector<8x1xf32> to vector<8x32xf32>
    %21 = arith.mulf %16, %20 : vector<8x32xf32>
    %22 = vector.broadcast %2 : vector<1x32xf32> to vector<8x32xf32>
    %23 = arith.mulf %21, %22 : vector<8x32xf32>
    %24 = vector.broadcast %3 : vector<1x32xf32> to vector<8x32xf32>
    %25 = arith.addf %23, %24 : vector<8x32xf32>
    %26 = arith.truncf %25 : vector<8x32xf32> to vector<8x32xbf16>
    %c0_10 = arith.constant 0 : index
    %c0_11 = arith.constant 0 : index
    %c0_12 = arith.constant 0 : index
    %27 = vector.load %arg4[%c0_10, %c0_11, %c0_12] : memref<4x32x8xbf16, #tpu.memory_space<vmem>>, vector<1x32x8xbf16>
    %28 = vector.shape_cast %27 : vector<1x32x8xbf16> to vector<32x8xbf16>
    %cst_13 = arith.constant dense<0.000000e+00> : vector<8x8xf32>
    %29 = tpu.matmul %26, %28, %cst_13 {dimension_numbers = #tpu.dot_dimension_numbers<[1], [0], [0], [1], [0, 0, 1, 1], [], []>} : vector<8x32xbf16>, vector<32x8xbf16>, vector<8x8xf32> -> vector<8x8xf32>
    %c1 = arith.constant 1 : index
    %c0_14 = arith.constant 0 : index
    %c0_15 = arith.constant 0 : index
    %30 = vector.load %arg4[%c1, %c0_14, %c0_15] : memref<4x32x8xbf16, #tpu.memory_space<vmem>>, vector<1x32x8xbf16>
    %31 = vector.shape_cast %30 : vector<1x32x8xbf16> to vector<32x8xbf16>
    %cst_16 = arith.constant dense<0.000000e+00> : vector<8x8xf32>
    %32 = tpu.matmul %26, %31, %cst_16 {dimension_numbers = #tpu.dot_dimension_numbers<[1], [0], [0], [1], [0, 0, 1, 1], [], []>} : vector<8x32xbf16>, vector<32x8xbf16>, vector<8x8xf32> -> vector<8x8xf32>
    %c2 = arith.constant 2 : index
    %c0_17 = arith.constant 0 : index
    %c0_18 = arith.constant 0 : index
    %33 = vector.load %arg4[%c2, %c0_17, %c0_18] : memref<4x32x8xbf16, #tpu.memory_space<vmem>>, vector<1x32x8xbf16>
    %34 = vector.shape_cast %33 : vector<1x32x8xbf16> to vector<32x8xbf16>
    %cst_19 = arith.constant dense<0.000000e+00> : vector<8x8xf32>
    %35 = tpu.matmul %26, %34, %cst_19 {dimension_numbers = #tpu.dot_dimension_numbers<[1], [0], [0], [1], [0, 0, 1, 1], [], []>} : vector<8x32xbf16>, vector<32x8xbf16>, vector<8x8xf32> -> vector<8x8xf32>
    %c3 = arith.constant 3 : index
    %c0_20 = arith.constant 0 : index
    %c0_21 = arith.constant 0 : index
    %36 = vector.load %arg4[%c3, %c0_20, %c0_21] : memref<4x32x8xbf16, #tpu.memory_space<vmem>>, vector<1x32x8xbf16>
    %37 = vector.shape_cast %36 : vector<1x32x8xbf16> to vector<32x8xbf16>
    %cst_22 = arith.constant dense<0.000000e+00> : vector<8x8xf32>
    %38 = tpu.matmul %26, %37, %cst_22 {dimension_numbers = #tpu.dot_dimension_numbers<[1], [0], [0], [1], [0, 0, 1, 1], [], []>} : vector<8x32xbf16>, vector<32x8xbf16>, vector<8x8xf32> -> vector<8x8xf32>
    %39 = vector.shape_cast %29 : vector<8x8xf32> to vector<1x8x8xf32>
    %40 = vector.shape_cast %32 : vector<8x8xf32> to vector<1x8x8xf32>
    %41 = vector.shape_cast %35 : vector<8x8xf32> to vector<1x8x8xf32>
    %42 = vector.shape_cast %38 : vector<8x8xf32> to vector<1x8x8xf32>
    %43 = tpu.concatenate %39, %40, %41, %42 in 0 : vector<1x8x8xf32>, vector<1x8x8xf32>, vector<1x8x8xf32>, vector<1x8x8xf32> -> vector<4x8x8xf32>
    %c0_23 = arith.constant 0 : index
    %c0_24 = arith.constant 0 : index
    %c0_25 = arith.constant 0 : index
    %44 = vector.load %arg7[%c0_23, %c0_24, %c0_25] : memref<4x1x8xf32, #tpu.memory_space<vmem>>, vector<4x1x8xf32>
    %45 = vector.broadcast %44 : vector<4x1x8xf32> to vector<4x8x8xf32>
    %46 = arith.addf %43, %45 : vector<4x8x8xf32>
    %c0_26 = arith.constant 0 : index
    %c0_27 = arith.constant 0 : index
    %c0_28 = arith.constant 0 : index
    %47 = vector.load %arg5[%c0_26, %c0_27, %c0_28] : memref<4x32x8xbf16, #tpu.memory_space<vmem>>, vector<1x32x8xbf16>
    %48 = vector.shape_cast %47 : vector<1x32x8xbf16> to vector<32x8xbf16>
    %cst_29 = arith.constant dense<0.000000e+00> : vector<8x8xf32>
    %49 = tpu.matmul %26, %48, %cst_29 {dimension_numbers = #tpu.dot_dimension_numbers<[1], [0], [0], [1], [0, 0, 1, 1], [], []>} : vector<8x32xbf16>, vector<32x8xbf16>, vector<8x8xf32> -> vector<8x8xf32>
    %c1_30 = arith.constant 1 : index
    %c0_31 = arith.constant 0 : index
    %c0_32 = arith.constant 0 : index
    %50 = vector.load %arg5[%c1_30, %c0_31, %c0_32] : memref<4x32x8xbf16, #tpu.memory_space<vmem>>, vector<1x32x8xbf16>
    %51 = vector.shape_cast %50 : vector<1x32x8xbf16> to vector<32x8xbf16>
    %cst_33 = arith.constant dense<0.000000e+00> : vector<8x8xf32>
    %52 = tpu.matmul %26, %51, %cst_33 {dimension_numbers = #tpu.dot_dimension_numbers<[1], [0], [0], [1], [0, 0, 1, 1], [], []>} : vector<8x32xbf16>, vector<32x8xbf16>, vector<8x8xf32> -> vector<8x8xf32>
    %c2_34 = arith.constant 2 : index
    %c0_35 = arith.constant 0 : index
    %c0_36 = arith.constant 0 : index
    %53 = vector.load %arg5[%c2_34, %c0_35, %c0_36] : memref<4x32x8xbf16, #tpu.memory_space<vmem>>, vector<1x32x8xbf16>
    %54 = vector.shape_cast %53 : vector<1x32x8xbf16> to vector<32x8xbf16>
    %cst_37 = arith.constant dense<0.000000e+00> : vector<8x8xf32>
    %55 = tpu.matmul %26, %54, %cst_37 {dimension_numbers = #tpu.dot_dimension_numbers<[1], [0], [0], [1], [0, 0, 1, 1], [], []>} : vector<8x32xbf16>, vector<32x8xbf16>, vector<8x8xf32> -> vector<8x8xf32>
    %c3_38 = arith.constant 3 : index
    %c0_39 = arith.constant 0 : index
    %c0_40 = arith.constant 0 : index
    %56 = vector.load %arg5[%c3_38, %c0_39, %c0_40] : memref<4x32x8xbf16, #tpu.memory_space<vmem>>, vector<1x32x8xbf16>
    %57 = vector.shape_cast %56 : vector<1x32x8xbf16> to vector<32x8xbf16>
    %cst_41 = arith.constant dense<0.000000e+00> : vector<8x8xf32>
    %58 = tpu.matmul %26, %57, %cst_41 {dimension_numbers = #tpu.dot_dimension_numbers<[1], [0], [0], [1], [0, 0, 1, 1], [], []>} : vector<8x32xbf16>, vector<32x8xbf16>, vector<8x8xf32> -> vector<8x8xf32>
    %59 = vector.shape_cast %49 : vector<8x8xf32> to vector<1x8x8xf32>
    %60 = vector.shape_cast %52 : vector<8x8xf32> to vector<1x8x8xf32>
    %61 = vector.shape_cast %55 : vector<8x8xf32> to vector<1x8x8xf32>
    %62 = vector.shape_cast %58 : vector<8x8xf32> to vector<1x8x8xf32>
    %63 = tpu.concatenate %59, %60, %61, %62 in 0 : vector<1x8x8xf32>, vector<1x8x8xf32>, vector<1x8x8xf32>, vector<1x8x8xf32> -> vector<4x8x8xf32>
    %c0_42 = arith.constant 0 : index
    %c0_43 = arith.constant 0 : index
    %c0_44 = arith.constant 0 : index
    %64 = vector.load %arg8[%c0_42, %c0_43, %c0_44] : memref<4x1x8xf32, #tpu.memory_space<vmem>>, vector<4x1x8xf32>
    %65 = vector.broadcast %64 : vector<4x1x8xf32> to vector<4x8x8xf32>
    %66 = arith.addf %63, %65 : vector<4x8x8xf32>
    %c0_45 = arith.constant 0 : index
    %c0_46 = arith.constant 0 : index
    %c0_47 = arith.constant 0 : index
    %67 = vector.load %arg6[%c0_45, %c0_46, %c0_47] : memref<4x32x8xbf16, #tpu.memory_space<vmem>>, vector<1x32x8xbf16>
    %68 = vector.shape_cast %67 : vector<1x32x8xbf16> to vector<32x8xbf16>
    %cst_48 = arith.constant dense<0.000000e+00> : vector<8x8xf32>
    %69 = tpu.matmul %26, %68, %cst_48 {dimension_numbers = #tpu.dot_dimension_numbers<[1], [0], [0], [1], [0, 0, 1, 1], [], []>} : vector<8x32xbf16>, vector<32x8xbf16>, vector<8x8xf32> -> vector<8x8xf32>
    %c1_49 = arith.constant 1 : index
    %c0_50 = arith.constant 0 : index
    %c0_51 = arith.constant 0 : index
    %70 = vector.load %arg6[%c1_49, %c0_50, %c0_51] : memref<4x32x8xbf16, #tpu.memory_space<vmem>>, vector<1x32x8xbf16>
    %71 = vector.shape_cast %70 : vector<1x32x8xbf16> to vector<32x8xbf16>
    %cst_52 = arith.constant dense<0.000000e+00> : vector<8x8xf32>
    %72 = tpu.matmul %26, %71, %cst_52 {dimension_numbers = #tpu.dot_dimension_numbers<[1], [0], [0], [1], [0, 0, 1, 1], [], []>} : vector<8x32xbf16>, vector<32x8xbf16>, vector<8x8xf32> -> vector<8x8xf32>
    %c2_53 = arith.constant 2 : index
    %c0_54 = arith.constant 0 : index
    %c0_55 = arith.constant 0 : index
    %73 = vector.load %arg6[%c2_53, %c0_54, %c0_55] : memref<4x32x8xbf16, #tpu.memory_space<vmem>>, vector<1x32x8xbf16>
    %74 = vector.shape_cast %73 : vector<1x32x8xbf16> to vector<32x8xbf16>
    %cst_56 = arith.constant dense<0.000000e+00> : vector<8x8xf32>
    %75 = tpu.matmul %26, %74, %cst_56 {dimension_numbers = #tpu.dot_dimension_numbers<[1], [0], [0], [1], [0, 0, 1, 1], [], []>} : vector<8x32xbf16>, vector<32x8xbf16>, vector<8x8xf32> -> vector<8x8xf32>
    %c3_57 = arith.constant 3 : index
    %c0_58 = arith.constant 0 : index
    %c0_59 = arith.constant 0 : index
    %76 = vector.load %arg6[%c3_57, %c0_58, %c0_59] : memref<4x32x8xbf16, #tpu.memory_space<vmem>>, vector<1x32x8xbf16>
    %77 = vector.shape_cast %76 : vector<1x32x8xbf16> to vector<32x8xbf16>
    %cst_60 = arith.constant dense<0.000000e+00> : vector<8x8xf32>
    %78 = tpu.matmul %26, %77, %cst_60 {dimension_numbers = #tpu.dot_dimension_numbers<[1], [0], [0], [1], [0, 0, 1, 1], [], []>} : vector<8x32xbf16>, vector<32x8xbf16>, vector<8x8xf32> -> vector<8x8xf32>
    %79 = vector.shape_cast %69 : vector<8x8xf32> to vector<1x8x8xf32>
    %80 = vector.shape_cast %72 : vector<8x8xf32> to vector<1x8x8xf32>
    %81 = vector.shape_cast %75 : vector<8x8xf32> to vector<1x8x8xf32>
    %82 = vector.shape_cast %78 : vector<8x8xf32> to vector<1x8x8xf32>
    %83 = tpu.concatenate %79, %80, %81, %82 in 0 : vector<1x8x8xf32>, vector<1x8x8xf32>, vector<1x8x8xf32>, vector<1x8x8xf32> -> vector<4x8x8xf32>
    %c0_61 = arith.constant 0 : index
    %c0_62 = arith.constant 0 : index
    %c0_63 = arith.constant 0 : index
    %84 = vector.load %arg9[%c0_61, %c0_62, %c0_63] : memref<4x1x8xf32, #tpu.memory_space<vmem>>, vector<4x1x8xf32>
    %85 = vector.broadcast %84 : vector<4x1x8xf32> to vector<4x8x8xf32>
    %86 = arith.addf %83, %85 : vector<4x8x8xf32>
    %87 = tpu.iota {dimensions = array<i32: 0>} : vector<8x8xi32>
    %88 = tpu.iota {dimensions = array<i32: 1>} : vector<8x8xi32>
    %89 = arith.cmpi sle, %88, %87 : vector<8x8xi32>
    %cst_64 = arith.constant 0.000000e+00 : f32
    %cst_65 = arith.constant -1.000000e+06 : f32
    %90 = vector.broadcast %cst_64 : f32 to vector<8x8xf32>
    %91 = vector.broadcast %cst_65 : f32 to vector<8x8xf32>
    %92 = arith.select %89, %90, %91 : vector<8x8xi1>, vector<8x8xf32>
    %93 = arith.truncf %46 : vector<4x8x8xf32> to vector<4x8x8xbf16>
    %94 = arith.truncf %66 : vector<4x8x8xf32> to vector<4x8x8xbf16>
    "tpu.trace_start"() <{level = 10 : i32, message = "htf,hsf->hts"}> : () -> ()
    %cst_66 = arith.constant dense<0.000000e+00> : vector<4x8x8xf32>
    %95 = tpu.matmul %93, %94, %cst_66 {dimension_numbers = #tpu.dot_dimension_numbers<[2], [2], [1], [1], [0, 0, 0, 1, 1, 1], [0], [0]>} : vector<4x8x8xbf16>, vector<4x8x8xbf16>, vector<4x8x8xf32> -> vector<4x8x8xf32>
    "tpu.trace_stop"() : () -> ()
    %cst_67 = arith.constant 0.353553385 : f32
    %96 = vector.broadcast %cst_67 : f32 to vector<4x8x8xf32>
    %97 = arith.mulf %95, %96 : vector<4x8x8xf32>
    %98 = vector.shape_cast %92 : vector<8x8xf32> to vector<1x8x8xf32>
    %99 = vector.broadcast %98 : vector<1x8x8xf32> to vector<4x8x8xf32>
    %100 = arith.addf %97, %99 : vector<4x8x8xf32>
    %cst_68 = arith.constant dense<0xFF800000> : vector<4x8xf32>
    %101 = vector.multi_reduction <maximumf>, %100, %cst_68 [2] : vector<4x8x8xf32> to vector<4x8xf32>
    %102 = vector.shape_cast %101 : vector<4x8xf32> to vector<4x8x1xf32>
    %103 = vector.broadcast %102 : vector<4x8x1xf32> to vector<4x8x8xf32>
    %104 = arith.subf %100, %103 : vector<4x8x8xf32>
    %105 = math.exp %104 : vector<4x8x8xf32>
    %cst_69 = arith.constant dense<0.000000e+00> : vector<4x8xf32>
    %106 = vector.multi_reduction <add>, %105, %cst_69 [2] : vector<4x8x8xf32> to vector<4x8xf32>
    %107 = vector.shape_cast %106 : vector<4x8xf32> to vector<4x8x1xf32>
    %108 = vector.broadcast %107 : vector<4x8x1xf32> to vector<4x8x8xf32>
    %109 = arith.divf %105, %108 : vector<4x8x8xf32>
    %110 = arith.truncf %109 : vector<4x8x8xf32> to vector<4x8x8xbf16>
    %111 = arith.truncf %86 : vector<4x8x8xf32> to vector<4x8x8xbf16>
    "tpu.trace_start"() <{level = 10 : i32, message = "hts,hsf->htf"}> : () -> ()
    %cst_70 = arith.constant dense<0.000000e+00> : vector<4x8x8xf32>
    %112 = tpu.matmul %110, %111, %cst_70 {dimension_numbers = #tpu.dot_dimension_numbers<[2], [1], [1], [2], [0, 0, 0, 1, 1, 2], [0], [0]>} : vector<4x8x8xbf16>, vector<4x8x8xbf16>, vector<4x8x8xf32> -> vector<4x8x8xf32>
    "tpu.trace_stop"() : () -> ()
    %c0_71 = arith.constant 0 : index
    %c0_72 = arith.constant 0 : index
    %113 = vector.load %arg11[%c0_71, %c0_72] : memref<1x32xf32, #tpu.memory_space<vmem>>, vector<1x32xf32>
    %114 = vector.extract_strided_slice %112 {offsets = [0, 0, 0], sizes = [1, 8, 8], strides = [1, 1, 1]} : vector<4x8x8xf32> to vector<1x8x8xf32>
    %115 = vector.shape_cast %114 : vector<1x8x8xf32> to vector<8x8xf32>
    %116 = arith.truncf %115 : vector<8x8xf32> to vector<8x8xbf16>
    %c0_73 = arith.constant 0 : index
    %c0_74 = arith.constant 0 : index
    %c0_75 = arith.constant 0 : index
    %117 = vector.load %arg10[%c0_73, %c0_74, %c0_75] : memref<4x8x32xbf16, #tpu.memory_space<vmem>>, vector<1x8x32xbf16>
    %118 = vector.shape_cast %117 : vector<1x8x32xbf16> to vector<8x32xbf16>
    %cst_76 = arith.constant dense<0.000000e+00> : vector<8x32xf32>
    %119 = tpu.matmul %116, %118, %cst_76 {dimension_numbers = #tpu.dot_dimension_numbers<[1], [0], [0], [1], [0, 0, 1, 1], [], []>} : vector<8x8xbf16>, vector<8x32xbf16>, vector<8x32xf32> -> vector<8x32xf32>
    %120 = vector.broadcast %113 : vector<1x32xf32> to vector<8x32xf32>
    %121 = arith.addf %120, %119 : vector<8x32xf32>
    %122 = vector.extract_strided_slice %112 {offsets = [1, 0, 0], sizes = [1, 8, 8], strides = [1, 1, 1]} : vector<4x8x8xf32> to vector<1x8x8xf32>
    %123 = vector.shape_cast %122 : vector<1x8x8xf32> to vector<8x8xf32>
    %124 = arith.truncf %123 : vector<8x8xf32> to vector<8x8xbf16>
    %c1_77 = arith.constant 1 : index
    %c0_78 = arith.constant 0 : index
    %c0_79 = arith.constant 0 : index
    %125 = vector.load %arg10[%c1_77, %c0_78, %c0_79] : memref<4x8x32xbf16, #tpu.memory_space<vmem>>, vector<1x8x32xbf16>
    %126 = vector.shape_cast %125 : vector<1x8x32xbf16> to vector<8x32xbf16>
    %cst_80 = arith.constant dense<0.000000e+00> : vector<8x32xf32>
    %127 = tpu.matmul %124, %126, %cst_80 {dimension_numbers = #tpu.dot_dimension_numbers<[1], [0], [0], [1], [0, 0, 1, 1], [], []>} : vector<8x8xbf16>, vector<8x32xbf16>, vector<8x32xf32> -> vector<8x32xf32>
    %128 = arith.addf %121, %127 : vector<8x32xf32>
    %129 = vector.extract_strided_slice %112 {offsets = [2, 0, 0], sizes = [1, 8, 8], strides = [1, 1, 1]} : vector<4x8x8xf32> to vector<1x8x8xf32>
    %130 = vector.shape_cast %129 : vector<1x8x8xf32> to vector<8x8xf32>
    %131 = arith.truncf %130 : vector<8x8xf32> to vector<8x8xbf16>
    %c2_81 = arith.constant 2 : index
    %c0_82 = arith.constant 0 : index
    %c0_83 = arith.constant 0 : index
    %132 = vector.load %arg10[%c2_81, %c0_82, %c0_83] : memref<4x8x32xbf16, #tpu.memory_space<vmem>>, vector<1x8x32xbf16>
    %133 = vector.shape_cast %132 : vector<1x8x32xbf16> to vector<8x32xbf16>
    %cst_84 = arith.constant dense<0.000000e+00> : vector<8x32xf32>
    %134 = tpu.matmul %131, %133, %cst_84 {dimension_numbers = #tpu.dot_dimension_numbers<[1], [0], [0], [1], [0, 0, 1, 1], [], []>} : vector<8x8xbf16>, vector<8x32xbf16>, vector<8x32xf32> -> vector<8x32xf32>
    %135 = arith.addf %128, %134 : vector<8x32xf32>
    %136 = vector.extract_strided_slice %112 {offsets = [3, 0, 0], sizes = [1, 8, 8], strides = [1, 1, 1]} : vector<4x8x8xf32> to vector<1x8x8xf32>
    %137 = vector.shape_cast %136 : vector<1x8x8xf32> to vector<8x8xf32>
    %138 = arith.truncf %137 : vector<8x8xf32> to vector<8x8xbf16>
    %c3_85 = arith.constant 3 : index
    %c0_86 = arith.constant 0 : index
    %c0_87 = arith.constant 0 : index
    %139 = vector.load %arg10[%c3_85, %c0_86, %c0_87] : memref<4x8x32xbf16, #tpu.memory_space<vmem>>, vector<1x8x32xbf16>
    %140 = vector.shape_cast %139 : vector<1x8x32xbf16> to vector<8x32xbf16>
    %cst_88 = arith.constant dense<0.000000e+00> : vector<8x32xf32>
    %141 = tpu.matmul %138, %140, %cst_88 {dimension_numbers = #tpu.dot_dimension_numbers<[1], [0], [0], [1], [0, 0, 1, 1], [], []>} : vector<8x8xbf16>, vector<8x32xbf16>, vector<8x32xf32> -> vector<8x32xf32>
    %142 = arith.addf %135, %141 : vector<8x32xf32>
    %143 = arith.addf %1, %142 : vector<8x32xf32>
    %c0_89 = arith.constant 0 : index
    %c0_90 = arith.constant 0 : index
    %144 = vector.load %arg12[%c0_89, %c0_90] : memref<1x32xf32, #tpu.memory_space<vmem>>, vector<1x32xf32>
    %c0_91 = arith.constant 0 : index
    %c0_92 = arith.constant 0 : index
    %145 = vector.load %arg13[%c0_91, %c0_92] : memref<1x32xf32, #tpu.memory_space<vmem>>, vector<1x32xf32>
    %cst_93 = arith.constant dense<0.000000e+00> : vector<8xf32>
    %146 = vector.multi_reduction <add>, %143, %cst_93 [1] : vector<8x32xf32> to vector<8xf32>
    %147 = vector.shape_cast %146 : vector<8xf32> to vector<8x1xf32>
    %cst_94 = arith.constant 3.200000e+01 : f32
    %148 = vector.broadcast %cst_94 : f32 to vector<8x1xf32>
    %149 = arith.divf %147, %148 : vector<8x1xf32>
    %150 = vector.broadcast %149 : vector<8x1xf32> to vector<8x32xf32>
    %151 = arith.subf %143, %150 : vector<8x32xf32>
    %152 = arith.mulf %151, %151 : vector<8x32xf32>
    %cst_95 = arith.constant dense<0.000000e+00> : vector<8xf32>
    %153 = vector.multi_reduction <add>, %152, %cst_95 [1] : vector<8x32xf32> to vector<8xf32>
    %154 = vector.shape_cast %153 : vector<8xf32> to vector<8x1xf32>
    %cst_96 = arith.constant 3.200000e+01 : f32
    %155 = vector.broadcast %cst_96 : f32 to vector<8x1xf32>
    %156 = arith.divf %154, %155 : vector<8x1xf32>
    %157 = vector.broadcast %149 : vector<8x1xf32> to vector<8x32xf32>
    %158 = arith.subf %143, %157 : vector<8x32xf32>
    %cst_97 = arith.constant 9.99999974E-6 : f32
    %159 = vector.broadcast %cst_97 : f32 to vector<8x1xf32>
    %160 = arith.addf %156, %159 : vector<8x1xf32>
    %161 = math.rsqrt %160 : vector<8x1xf32>
    %162 = vector.broadcast %161 : vector<8x1xf32> to vector<8x32xf32>
    %163 = arith.mulf %158, %162 : vector<8x32xf32>
    %164 = vector.broadcast %144 : vector<1x32xf32> to vector<8x32xf32>
    %165 = arith.mulf %163, %164 : vector<8x32xf32>
    %166 = vector.broadcast %145 : vector<1x32xf32> to vector<8x32xf32>
    %167 = arith.addf %165, %166 : vector<8x32xf32>
    %168 = arith.truncf %167 : vector<8x32xf32> to vector<8x32xbf16>
    %c0_98 = arith.constant 0 : index
    %c0_99 = arith.constant 0 : index
    %169 = vector.load %arg14[%c0_98, %c0_99] : memref<32x64xbf16, #tpu.memory_space<vmem>>, vector<32x64xbf16>
    %cst_100 = arith.constant dense<0.000000e+00> : vector<8x64xf32>
    %170 = tpu.matmul %168, %169, %cst_100 {dimension_numbers = #tpu.dot_dimension_numbers<[1], [0], [0], [1], [0, 0, 1, 1], [], []>} : vector<8x32xbf16>, vector<32x64xbf16>, vector<8x64xf32> -> vector<8x64xf32>
    %c0_101 = arith.constant 0 : index
    %c0_102 = arith.constant 0 : index
    %171 = vector.load %arg15[%c0_101, %c0_102] : memref<1x64xf32, #tpu.memory_space<vmem>>, vector<1x64xf32>
    %172 = vector.broadcast %171 : vector<1x64xf32> to vector<8x64xf32>
    %173 = arith.addf %170, %172 : vector<8x64xf32>
    %cst_103 = arith.constant 0.000000e+00 : f32
    %174 = vector.broadcast %cst_103 : f32 to vector<8x64xf32>
    %175 = arith.maximumf %173, %174 : vector<8x64xf32>
    %176 = arith.truncf %175 : vector<8x64xf32> to vector<8x64xbf16>
    %c0_104 = arith.constant 0 : index
    %c0_105 = arith.constant 0 : index
    %177 = vector.load %arg16[%c0_104, %c0_105] : memref<64x32xbf16, #tpu.memory_space<vmem>>, vector<64x32xbf16>
    %cst_106 = arith.constant dense<0.000000e+00> : vector<8x32xf32>
    %178 = tpu.matmul %176, %177, %cst_106 {dimension_numbers = #tpu.dot_dimension_numbers<[1], [0], [0], [1], [0, 0, 1, 1], [], []>} : vector<8x64xbf16>, vector<64x32xbf16>, vector<8x32xf32> -> vector<8x32xf32>
    %c0_107 = arith.constant 0 : index
    %c0_108 = arith.constant 0 : index
    %179 = vector.load %arg17[%c0_107, %c0_108] : memref<1x32xf32, #tpu.memory_space<vmem>>, vector<1x32xf32>
    %180 = vector.broadcast %179 : vector<1x32xf32> to vector<8x32xf32>
    %181 = arith.addf %178, %180 : vector<8x32xf32>
    %182 = arith.addf %143, %181 : vector<8x32xf32>
    %c0_109 = arith.constant 0 : index
    %c0_110 = arith.constant 0 : index
    %c0_111 = arith.constant 0 : index
    %183 = vector.load %arg18[%c0_109, %c0_110, %c0_111] : memref<1x8x32xf32, #tpu.memory_space<vmem>>, vector<1x8x32xf32>
    %184 = vector.shape_cast %183 : vector<1x8x32xf32> to vector<8x32xf32>
    %185 = vector.shape_cast %182 : vector<8x32xf32> to vector<1x8x32xf32>
    tpu.vector_store %arg18[%c0_109, %c0_110, %c0_111], %185 {strides = array<i32>} : memref<1x8x32xf32, #tpu.memory_space<vmem>>, vector<1x8x32xf32>,
    return
  }
  func.func @transform_0(%arg0: i32) -> (i32, i32, i32) {
    %c0_i32 = arith.constant 0 : i32
    %c0_i32_0 = arith.constant 0 : i32
    %c0_i32_1 = arith.constant 0 : i32
    return %arg0, %c0_i32, %c0_i32_0 : i32, i32, i32
  }
  func.func @transform_1(%arg0: i32) -> (i32, i32) {
    %c0_i32 = arith.constant 0 : i32
    %c0_i32_0 = arith.constant 0 : i32
    %c0_i32_1 = arith.constant 0 : i32
    return %c0_i32, %c0_i32_0 : i32, i32
  }
  func.func @transform_2(%arg0: i32) -> (i32, i32) {
    %c0_i32 = arith.constant 0 : i32
    %c0_i32_0 = arith.constant 0 : i32
    %c0_i32_1 = arith.constant 0 : i32
    return %c0_i32, %c0_i32_0 : i32, i32
  }
  func.func @transform_3(%arg0: i32) -> (i32, i32, i32) {
    %c0_i32 = arith.constant 0 : i32
    %c0_i32_0 = arith.constant 0 : i32
    %c0_i32_1 = arith.constant 0 : i32
    %c0_i32_2 = arith.constant 0 : i32
    return %c0_i32, %c0_i32_0, %c0_i32_1 : i32, i32, i32
  }
  func.func @transform_4(%arg0: i32) -> (i32, i32, i32) {
    %c0_i32 = arith.constant 0 : i32
    %c0_i32_0 = arith.constant 0 : i32
    %c0_i32_1 = arith.constant 0 : i32
    %c0_i32_2 = arith.constant 0 : i32
    return %c0_i32, %c0_i32_0, %c0_i32_1 : i32, i32, i32
  }
  func.func @transform_5(%arg0: i32) -> (i32, i32, i32) {
    %c0_i32 = arith.constant 0 : i32
    %c0_i32_0 = arith.constant 0 : i32
    %c0_i32_1 = arith.constant 0 : i32
    %c0_i32_2 = arith.constant 0 : i32
    return %c0_i32, %c0_i32_0, %c0_i32_1 : i32, i32, i32
  }
  func.func @transform_6(%arg0: i32) -> (i32, i32, i32) {
    %c0_i32 = arith.constant 0 : i32
    %c0_i32_0 = arith.constant 0 : i32
    %c0_i32_1 = arith.constant 0 : i32
    %c0_i32_2 = arith.constant 0 : i32
    return %c0_i32, %c0_i32_0, %c0_i32_1 : i32, i32, i32
  }
  func.func @transform_7(%arg0: i32) -> (i32, i32, i32) {
    %c0_i32 = arith.constant 0 : i32
    %c0_i32_0 = arith.constant 0 : i32
    %c0_i32_1 = arith.constant 0 : i32
    %c0_i32_2 = arith.constant 0 : i32
    return %c0_i32, %c0_i32_0, %c0_i32_1 : i32, i32, i32
  }
  func.func @transform_8(%arg0: i32) -> (i32, i32, i32) {
    %c0_i32 = arith.constant 0 : i32
    %c0_i32_0 = arith.constant 0 : i32
    %c0_i32_1 = arith.constant 0 : i32
    %c0_i32_2 = arith.constant 0 : i32
    return %c0_i32, %c0_i32_0, %c0_i32_1 : i32, i32, i32
  }
  func.func @transform_9(%arg0: i32) -> (i32, i32, i32) {
    %c0_i32 = arith.constant 0 : i32
    %c0_i32_0 = arith.constant 0 : i32
    %c0_i32_1 = arith.constant 0 : i32
    %c0_i32_2 = arith.constant 0 : i32
    return %c0_i32, %c0_i32_0, %c0_i32_1 : i32, i32, i32
  }
  func.func @transform_10(%arg0: i32) -> (i32, i32) {
    %c0_i32 = arith.constant 0 : i32
    %c0_i32_0 = arith.constant 0 : i32
    %c0_i32_1 = arith.constant 0 : i32
    return %c0_i32, %c0_i32_0 : i32, i32
  }
  func.func @transform_11(%arg0: i32) -> (i32, i32) {
    %c0_i32 = arith.constant 0 : i32
    %c0_i32_0 = arith.constant 0 : i32
    %c0_i32_1 = arith.constant 0 : i32
    return %c0_i32, %c0_i32_0 : i32, i32
  }
  func.func @transform_12(%arg0: i32) -> (i32, i32) {
    %c0_i32 = arith.constant 0 : i32
    %c0_i32_0 = arith.constant 0 : i32
    %c0_i32_1 = arith.constant 0 : i32
    return %c0_i32, %c0_i32_0 : i32, i32
  }
  func.func @transform_13(%arg0: i32) -> (i32, i32) {
    %c0_i32 = arith.constant 0 : i32
    %c0_i32_0 = arith.constant 0 : i32
    %c0_i32_1 = arith.constant 0 : i32
    return %c0_i32, %c0_i32_0 : i32, i32
  }
  func.func @transform_14(%arg0: i32) -> (i32, i32) {
    %c0_i32 = arith.constant 0 : i32
    %c0_i32_0 = arith.constant 0 : i32
    %c0_i32_1 = arith.constant 0 : i32
    return %c0_i32, %c0_i32_0 : i32, i32
  }
  func.func @transform_15(%arg0: i32) -> (i32, i32) {
    %c0_i32 = arith.constant 0 : i32
    %c0_i32_0 = arith.constant 0 : i32
    %c0_i32_1 = arith.constant 0 : i32
    return %c0_i32, %c0_i32_0 : i32, i32
  }
  func.func @transform_16(%arg0: i32) -> (i32, i32) {
    %c0_i32 = arith.constant 0 : i32
    %c0_i32_0 = arith.constant 0 : i32
    %c0_i32_1 = arith.constant 0 : i32
    return %c0_i32, %c0_i32_0 : i32, i32
  }
  func.func @transform_17(%arg0: i32) -> (i32, i32, i32) {
    %c0_i32 = arith.constant 0 : i32
    %c0_i32_0 = arith.constant 0 : i32
    %c0_i32_1 = arith.constant 0 : i32
    return %arg0, %c0_i32, %c0_i32_0 : i32, i32, i32
  }
}

</mosaic_0001>

<bundles_post_ra>
// kernel: tpu_custom_call.1
= control target key start
LH: loop header
LB: loop body
LE: loop exit
PB: predicated region body
PF: predicated region fallthrough
CT: control target
= control target key end

     0   :  { %s2360_s0 = inlined_call_operand.vmem [shape: f32[2,8,32], index: 0, kind: input, shape index: {}]   ;;  %s2361_s1 = inlined_call_operand.vmem [shape: f32[1,32], index: 1, kind: input, shape index: {}]   ;;  %s2362_s2 = inlined_call_operand.vmem [shape: f32[1,32], index: 2, kind: input, shape index: {}]   ;;  %s2363_s3 = inlined_call_operand.vmem [shape: bf16[4,32,8], index: 3, kind: input, shape index: {}]   ;;  %s2364_s4 = inlined_call_operand.vmem [shape: bf16[4,32,8], index: 4, kind: input, shape index: {}]   ;;  %s2365_s5 = inlined_call_operand.vmem [shape: bf16[4,32,8], index: 5, kind: input, shape index: {}]   ;;  %s2366_s6 = inlined_call_operand.vmem [shape: f32[4,1,8], index: 6, kind: input, shape index: {}]   ;;  %s2367_s7 = inlined_call_operand.vmem [shape: f32[4,1,8], index: 7, kind: input, shape index: {}]   ;;  %s2368_s8 = inlined_call_operand.vmem [shape: f32[4,1,8], index: 8, kind: input, shape index: {}]   ;;  %s2369_s9 = inlined_call_operand.vmem [shape: bf16[4,8,32], index: 9, kind: input, shape index: {}]   ;;  %s2370_s10 = inlined_call_operand.vmem [shape: f32[1,32], index: 10, kind: input, shape index: {}]   ;;  %s2371_s11 = inlined_call_operand.vmem [shape: f32[1,32], index: 11, kind: input, shape index: {}]   ;;  %s2372_s12 = inlined_call_operand.vmem [shape: f32[1,32], index: 12, kind: input, shape index: {}]   ;;  %s2373_s13 = inlined_call_operand.vmem [shape: bf16[32,64], index: 13, kind: input, shape index: {}]   ;;  %s2374_s14 = inlined_call_operand.vmem [shape: f32[1,64], index: 14, kind: input, shape index: {}]   ;;  %s2375_s15 = inlined_call_operand.vmem [shape: bf16[64,32], index: 15, kind: input, shape index: {}]   ;;  %s2376_s16 = inlined_call_operand.vmem [shape: f32[1,32], index: 16, kind: input, shape index: {}]   ;;  %s2377_s17 = inlined_call_operand.hbm [shape: f32[2,8,32], index: 17, kind: output, shape index: {}]  }
   0x1   :  { %2382 = sst [smem:[#allocation9_spill]] %s2360_s0 }
   0x2   :  { %2383 = sst [smem:[#allocation10_spill]] %s2361_s1 }
   0x3   :  { %2384 = sst [smem:[#allocation11_spill]] %s2362_s2 }
   0x4   :  { %2385 = sst [smem:[#allocation12_spill]] %s2363_s3 }
   0x5   :  { %22 = vsyncpa [#allocation3], 0 }
   0x6   :  { %24 = vsyncpa [#allocation3 + $0x1], 0  ;;  %s2047_s24 = smov 0   ;;  %s2049_s25 = smov 0  }
   0x7   :  { %s2051_s26 = smov 0   ;;  %s2053_s27 = smov 0  }
   0x8 LB: > { %2386 = sst [smem:[#allocation5_spill]] %s1949_s26  ;;  %s2068_s28 = sadd.s32 4294967295, %s1953_s27   ;;  %s1953_s27 = sphi %s2053_s27, %s2397_s27   ;;  %s1949_s26 = sphi %s2051_s26, %s2399_s26   ;;  %s1945_s25 = sphi %s2049_s25, %s2401_s25   ;;  %s1941_s24 = sphi %s2047_s24, %s2400_s24  }
   0x9   : > { %s1584_s29 = sadd.s32 4294967294, %s1953_s27   ;;  %s2072_s0 = sadd.s32 1, %s1953_s27  }
   0xa   : > { %2387 = sst [smem:[#allocation6_spill]] %s2072_s0  ;;  %s399_s30 = sadd.s32 1, %s1949_s26 }
   0xb   : > { %s396_s18 = ssub.s32 %s1953_s27, %s2072_s0  ;;  %p409_p0 = scmp.ne.s32.totalorder %s1949_s26, %s1945_s25 }
   0xc   : > { %p397_p1 = scmp.eq.s32.totalorder %s396_s18, 0  ;;  %p410_p2 = scmp.eq.s32.totalorder %s2068_s28, 1 }
   0xd   : > { %p415_p3 = scmp.ne.s32.totalorder %s1945_s25, %s1941_s24  ;;  %p416_p4 = scmp.eq.s32.totalorder %s1584_s29, 1 }
   0xe   : > { %s2083_s19 = scalar_select %p397_p1, %s1949_s26, %s399_s30  }
   0xf   : > { %p2085_p5 = por %p410_p2, %p409_p0  ;;  %p2089_p6 = por %p416_p4, %p415_p3 }
  0x10   : > { %2388 = sst [smem:[#allocation7_spill]] %s2083_s19  ;;  %p1587_p7 = scmp.ge.s32.totalorder %s1953_s27, 1 }
  0x11   : > { %s2390_s20 = scalar_select %p2089_p6, 1, 0 }
  0x12   : > { %p489_p8 = scmp.lt.s32.totalorder %s1953_s27, 3 }
  0x13   : > { %2391 = sst [smem:[#allocation8_spill]] %s2390_s20 }
  0x14   : > { %p490_p9 = pnand %p1587_p7, %p489_p8 }
  0x15   : > { %p540_p10 = scmp.lt.s32.totalorder (!%p490_p9), %s2068_s28, 1  ;;  %s2392_s30 = sld [smem:[#allocation9_spill]] (!%p490_p9) }
  0x16   : > { %493 = sbr.rel (%p490_p9) target bundleno = 1679 (0x68f), region = 88  ;;  %s2393_s3 = sld [smem:[#allocation12_spill]] (!%p490_p9) }
  0x17   : > { %s2395_s2 = sld [smem:[#allocation11_spill]] (!%p490_p9)  ;;  %s1776_s0 = sshll.u32 (!%p490_p9), %s2068_s28, 3 }
  0x18   : > { %s1520_s23 = scalar_lea.hbm (!%p490_p9), %s2377_s17, %s1776_s0 }
  0x1b   : > { %s541_s21 = scalar_select %p540_p10, %s2068_s28, 1  ;;  %vm548_vm0 = vcmask 261120   ;;  %v1955_v2 = vmov 32.0   ;;  %v1788_v23 = vld [vmem:[%s2364_s4 + $0x8] sm:$0xff]  ;;  %v1790_v24 = vld [vmem:[%s2364_s4 + $0x18] sm:$0xff]  ;;  %v1787_v28 = vld [vmem:[%s2364_s4] sm:$0xff] }
  0x1c   : > { %1869 = vrcp.f32 %v1955_v2  ;;  %v1780_v14 = vld [vmem:[%s2393_s3 + $0x8] sm:$0xff]  ;;  %v1782_v15 = vld [vmem:[%s2393_s3 + $0x18] sm:$0xff]  ;;  %v1779_v18 = vld [vmem:[%s2393_s3] sm:$0xff]  ;;  %vm1021_vm5 = vcmask 64512   ;;  %vm1213_vm6 = vcmask 1043456  }
  0x1d   : > { %s1589_s22 = sshll.u32 %s541_s21, 3  ;;  %v1784_v16 = vld [vmem:[%s2393_s3 + $0x28] sm:$0xff]  ;;  %v1786_v17 = vld [vmem:[%s2393_s3 + $0x38] sm:$0xff]  ;;  %612 = vmatpush.bf16.msra.mxu0 %v1780_v14  ;;  %642 = vmatpush.bf16.msra.mxu1 %v1782_v15  ;;  %v1781_v19 = vld [vmem:[%s2393_s3 + $0x10] sm:$0xff] }
  0x1e   : > { %s543_s18 = scalar_lea.vmem %s2392_s30, %s1589_s22  ;;  %672 = vmatpush.bf16.msra.mxu2 %v1784_v16  ;;  %702 = vmatpush.bf16.msra.mxu3 %v1786_v17  ;;  %v1783_v20 = vld [vmem:[%s2393_s3 + $0x20] sm:$0xff]  ;;  %v1785_v21 = vld [vmem:[%s2393_s3 + $0x30] sm:$0xff]  ;;  %v1792_v25 = vld [vmem:[%s2364_s4 + $0x28] sm:$0xff]  ;;  %s2394_s30 = sld [smem:[#allocation10_spill]] }
  0x1f   : > { %v2100_v0 = vld [vmem:[%s543_s18] sm:$0xff]  ;;  %v1794_v27 = vld [vmem:[%s2364_s4 + $0x38] sm:$0xff]  ;;  %v1789_v29 = vld [vmem:[%s2364_s4 + $0x10] sm:$0xff]  ;;  %s537_s18 = sand.u32 1, %s1945_s25  }
  0x20   : > { %v549_v1 = vsel %vm548_vm0, %v2100_v0, 0.0  ;;  %v1791_v31 = vld [vmem:[%s2364_s4 + $0x20] sm:$0xff]  ;;  %v1793_v32 = vld [vmem:[%s2364_s4 + $0x30] sm:$0xff]  ;;  %v1796_v46 = vld [vmem:[%s2365_s5 + $0x8] sm:$0xff]  ;;  %s1588_s26 = sshll.u32 %s537_s18, 3  ;;  %s1510_s28 = scalar_lea.sflag [#allocation3], %s537_s18 }
  0x21   : > { %550 = vadd.xlane.f32.xlu0 %v549_v1  ;;  %613 = vmatpush.bf16.msra.mxu0 %v1779_v18  ;;  %v1851_v41 = vld [vmem:[%s2395_s2] ss:$0 sm:$0xff]  ;;  %v1798_v47 = vld [vmem:[%s2365_s5 + $0x18] sm:$0xff]  ;;  %v1800_v48 = vld [vmem:[%s2365_s5 + $0x28] sm:$0xff]  ;;  %s539_s29 = scalar_lea.vmem [#allocation2], %s1588_s26  ;;  %s1524_s2 = sshll.u32 %s1520_s23, 4  ;;  %s1525_s2 = int_to_ptr.hbm [resolvable:$true] %s1524_s2 }
  0x22   : > { %v1870_v3 = vpop.eup %1869  ;;  %643 = vmatpush.bf16.msra.mxu1 %v1781_v19  ;;  %673 = vmatpush.bf16.msra.mxu2 %v1783_v20  ;;  %v1802_v49 = vld [vmem:[%s2365_s5 + $0x38] sm:$0xff]  ;;  %v1795_v50 = vld [vmem:[%s2365_s5] sm:$0xff]  ;;  %v1797_v51 = vld [vmem:[%s2365_s5 + $0x10] sm:$0xff]  ;;  %s1905_s3 = sshra.s32 %s1525_s2, 4  ;;  %s1911_s26 = scalar_lea.hbm %s2377_s17, 16  ;;  %s1906_s3 = int_to_ptr.hbm [resolvable:$true] %s1905_s3 }
  0x23   : > { %v553_v4 = vmul.f32 32.0, %v1870_v3  ;;  %vm557_vm1 = vweird.f32 %v1870_v3  ;;  %703 = vmatpush.bf16.msra.mxu3 %v1785_v21  ;;  %v1799_v52 = vld [vmem:[%s2365_s5 + $0x20] sm:$0xff]  ;;  %v1801_v53 = vld [vmem:[%s2365_s5 + $0x30] sm:$0xff]  ;;  %s1907_s19 = scalar_lea.hbm %s1906_s3, 8  ;;  %p1912_p0 = scmp.lt.s32.totalorder %s1906_s3, %s2377_s17 }
  0x24   : > { %v1850_v39 = vld [vmem:[%s2394_s30] ss:$0 sm:$0xff]  ;;  %v1857_v61 = vld [vmem:[%s2367_s7 + $0x1] ss:$0 sm:$0xff]  ;;  %s1522_s30 = sshll.u32 %s539_s29, 4  ;;  %p1908_p11 = scmp.ne.s32.totalorder %s1906_s3, %s1907_s19  ;;  %s1523_s30 = int_to_ptr.vmem [resolvable:$true] %s1522_s30 }
  0x25   : > { %v554_v5 = vsub.f32 1.0, %v553_v4  ;;  %751 = vmatpush.bf16.msrb.mxu0 %v1788_v23  ;;  %v1856_v60 = vld [vmem:[%s2367_s7] ss:$0 sm:$0xff]  ;;  %v1855_v23 = vld [vmem:[%s2366_s6 + $0x3] ss:$0 sm:$0xff]  ;;  %p1913_p1 = scmp.lt.s32.totalorder %s1911_s26, %s1907_s19 }
  0x26   : > { %781 = vmatpush.bf16.msrb.mxu1 %v1790_v24  ;;  %811 = vmatpush.bf16.msrb.mxu2 %v1792_v25  ;;  %p1909_p12 = pnand %p1908_p11, %p2085_p5 }
  0x27   : > { %v555_v6 = vmul.f32 %v1870_v3, %v554_v5  ;;  %841 = vmatpush.bf16.msrb.mxu3 %v1794_v27  ;;  %v1852_v5 = vld [vmem:[%s2366_s6] ss:$0 sm:$0xff]  ;;  %p1914_p2 = por %p1913_p1, %p1912_p0 }
  0x28   : > { %p1910_p13 = pneg %p1909_p12 }
  0x29   : > { %v556_v7 = vadd.f32 %v1870_v3, %v555_v6  ;;  %752 = vmatpush.bf16.msrb.mxu0 %v1787_v28 }
  0x2a   : > { %782 = vmatpush.bf16.msrb.mxu1 %v1789_v29  ;;  %812 = vmatpush.bf16.msrb.mxu2 %v1791_v31  ;;  %v1861_v31 = vld [vmem:[%s2368_s8 + $0x1] ss:$0 sm:$0xff]  ;;  %p1915_p3 = pnand %p1914_p2, %p1910_p13 }
  0x2b   : > { %v2104_v8 = vsel %vm557_vm1, %v1870_v3, %v556_v7  ;;  %842 = vmatpush.bf16.msrb.mxu3 %v1793_v32 }
  0x94   : > { %v551_v9 = vpop.xlane.xlu0 %550 }
  0x95   : > { %v559_v10 = vmul.f32 %v2104_v8, %v551_v9  ;;  %v1853_v9 = vld [vmem:[%s2366_s6 + $0x1] ss:$0 sm:$0xff] }
  0x97   : > { %v560_v11 = vsub.f32 %v2100_v0, %v559_v10  ;;  %v1858_v10 = vld [vmem:[%s2367_s7 + $0x2] ss:$0 sm:$0xff] }
  0x99   : > { %v561_v12 = vmul.f32 %v560_v11, %v560_v11 }
  0x9b   : > { %v562_v13 = vsel %vm548_vm0, %v561_v12, 0.0 }
  0x9c   : > { %563 = vadd.xlane.f32.xlu0 %v562_v13 }
 0x10f   : > { %v564_v22 = vpop.xlane.xlu0 %563 }
 0x110   : > { %v565_v26 = vmul.f32 %v564_v22, %v2104_v8  ;;  %v1854_v22 = vld [vmem:[%s2366_s6 + $0x2] ss:$0 sm:$0xff] }
 0x112   : > { %v566_v30 = vadd.f32 1e-05, %v565_v26 }
 0x114   : > { %1871 = vrsqrt.f32 %v566_v30  ;;  %vm573_vm3 = vweird.f32 %v566_v30 }
 0x11a   : > { %v1872_v33 = vpop.eup %1871 }
 0x11b   : > { %v568_v34 = vmul.f32 %v1872_v33, %v566_v30  ;;  %vm574_vm2 = vweird.f32 %v1872_v33  ;;  %v1860_v30 = vld [vmem:[%s2368_s8] ss:$0 sm:$0xff] }
 0x11c   : > { %vm575_vm4 = vmor %vm573_vm3, %vm574_vm2 }
 0x11d   : > { %v569_v35 = vmul.f32 %v1872_v33, %v568_v34 }
 0x11f   : > { %v570_v36 = vmul.f32 0.5, %v569_v35 }
 0x121   : > { %v571_v37 = vsub.f32 1.5, %v570_v36 }
 0x123   : > { %v572_v38 = vmul.f32 %v1872_v33, %v571_v37 }
 0x125   : > { %v576_v40 = vsel %vm575_vm4, %v1872_v33, %v572_v38 }
 0x126   : > { %v577_v42 = vmul.f32 %v576_v40, %v560_v11  ;;  %v1859_v11 = vld [vmem:[%s2367_s7 + $0x3] ss:$0 sm:$0xff] }
 0x128   : > { %v581_v43 = vmul.f32 %v1850_v39, %v577_v42 }
 0x12a   : > { %v585_v44 = vadd.f32 %v1851_v41, %v581_v43 }
 0x12c   : > { %v586_v45 = vpack.c.bf16 %v585_v44, %v585_v44  ;;  %v1862_v44 = vld [vmem:[%s2368_s8 + $0x2] ss:$0 sm:$0xff] }
 0x12e   : > { %1598 = vmatmul.msk.bf16.vlgmr.msra.gmra.mxu0 %vm548_vm0, %v586_v45  ;;  %1611 = vmatmul.msk.bf16.vlgmr.msra.gmra.mxu1 %vm548_vm0, %v586_v45 }
 0x12f   : > { %1624 = vmatmul.msk.bf16.vlgmr.msra.gmra.mxu2 %vm548_vm0, %v586_v45  ;;  %1637 = vmatmul.msk.bf16.vlgmr.msra.gmra.mxu3 %vm548_vm0, %v586_v45 }
 0x130   : > { %890 = vmatpush.bf16.msra.mxu0 %v1796_v46  ;;  %920 = vmatpush.bf16.msra.mxu1 %v1798_v47 }
 0x131   : > { %950 = vmatpush.bf16.msra.mxu2 %v1800_v48  ;;  %980 = vmatpush.bf16.msra.mxu3 %v1802_v49 }
 0x134   : > { %891 = vmatpush.bf16.msra.mxu0 %v1795_v50  ;;  %921 = vmatpush.bf16.msra.mxu1 %v1797_v51 }
 0x135   : > { %951 = vmatpush.bf16.msra.mxu2 %v1799_v52  ;;  %981 = vmatpush.bf16.msra.mxu3 %v1801_v53 }
 0x13e   : > { %1646 = vmatmul.msk.bf16.vlgmr.msrb.gmra.mxu0 %vm548_vm0, %v586_v45  ;;  %1659 = vmatmul.msk.bf16.vlgmr.msrb.gmra.mxu1 %vm548_vm0, %v586_v45 }
 0x13f   : > { %1672 = vmatmul.msk.bf16.vlgmr.msrb.gmra.mxu2 %vm548_vm0, %v586_v45  ;;  %1685 = vmatmul.msk.bf16.vlgmr.msrb.gmra.mxu3 %vm548_vm0, %v586_v45 }
 0x14e   : > { %1694 = vmatmul.msk.bf16.vlgmr.msra.gmra.mxu0 %vm548_vm0, %v586_v45  ;;  %1707 = vmatmul.msk.bf16.vlgmr.msra.gmra.mxu1 %vm548_vm0, %v586_v45 }
 0x14f   : > { %1720 = vmatmul.msk.bf16.vlgmr.msra.gmra.mxu2 %vm548_vm0, %v586_v45  ;;  %1733 = vmatmul.msk.bf16.vlgmr.msra.gmra.mxu3 %vm548_vm0, %v586_v45  ;;  %v1863_v45 = vld [vmem:[%s2368_s8 + $0x3] ss:$0 sm:$0xff] }
 0x1ab   : > { %v615_v54 = vpop.f32.mrf.mxu0  ;;  %v645_v55 = vpop.f32.mrf.mxu1 }
 0x1ac   : > { %v725_v16 = vadd.f32 %v1852_v5, %v615_v54  ;;  %v726_v17 = vadd.f32 %v1853_v9, %v645_v55 }
 0x1ae   : > { %v1013_v26 = vpack.c.bf16 %v725_v16, %v725_v16  ;;  %v1014_v27 = vpack.c.bf16 %v726_v17, %v726_v17 }
 0x1b2   : > { %v675_v56 = vpop.f32.mrf.mxu2  ;;  %v705_v57 = vpop.f32.mrf.mxu3 }
 0x1b3   : > { %v617_v58 = vpop.f32.mrf.mxu0  ;;  %v647_v59 = vpop.f32.mrf.mxu1  ;;  %v727_v32 = vadd.f32 %v1854_v22, %v675_v56  ;;  %v728_v33 = vadd.f32 %v1855_v23, %v705_v57 }
 0x1b5   : > { %v1015_v40 = vpack.c.bf16 %v727_v32, %v727_v32  ;;  %v1016_v41 = vpack.c.bf16 %v728_v33, %v728_v33 }
 0x1ba   : > { %v677_v62 = vpop.f32.mrf.mxu2  ;;  %v707_v63 = vpop.f32.mrf.mxu3 }
 0x1bb   : > { %v754_v1 = vpop.f32.mrf.mxu0  ;;  %v784_v2 = vpop.f32.mrf.mxu1 }
 0x1bc   : > { %v864_v3 = vadd.f32 %v1856_v60, %v754_v1  ;;  %v865_v4 = vadd.f32 %v1857_v61, %v784_v2  ;;  %v1007_v60 = vlaneseq  ;;  %v1956_v2 = vmov -1000000.0  }
 0x1be   : > { %v1017_v6 = vpack.c.bf16 %v864_v3, %v864_v3  ;;  %v1018_v7 = vpack.c.bf16 %v865_v4, %v865_v4  ;;  %v1008_v61 = vshrl.u32 %v1007_v60, 7  ;;  %v1010_v62 = vand.u32 127, %v1007_v60 }
 0x1c0   : > { %v1026_v12 = vsel %vm1021_vm5, %v1017_v6, 0  ;;  %v1045_v13 = vsel %vm1021_vm5, %v1018_v7, 0  ;;  %vm1011_vm7 = vcmp.le.s32.totalorder %v1010_v62, %v1008_v61 }
 0x1c1   : > { %1035 = vmatpush.bf16.xpose.msrb.mxu0 %v1026_v12  ;;  %1054 = vmatpush.bf16.xpose.msrb.mxu1 %v1045_v13  ;;  %v1012_v3 = vsel %vm1011_vm7, 0.0, %v1956_v2 }
 0x1c2   : > { %v814_v14 = vpop.f32.mrf.mxu2  ;;  %v844_v15 = vpop.f32.mrf.mxu3 }
 0x1c3   : > { %v866_v18 = vadd.f32 %v1858_v10, %v814_v14  ;;  %v867_v19 = vadd.f32 %v1859_v11, %v844_v15  ;;  %v756_v20 = vpop.f32.mrf.mxu0  ;;  %v786_v21 = vpop.f32.mrf.mxu1 }
 0x1c5   : > { %v1019_v24 = vpack.c.bf16 %v866_v18, %v866_v18  ;;  %v1020_v25 = vpack.c.bf16 %v867_v19, %v867_v19 }
 0x1c7   : > { %v1064_v28 = vsel %vm1021_vm5, %v1019_v24, 0  ;;  %v1083_v29 = vsel %vm1021_vm5, %v1020_v25, 0 }
 0x1c8   : > { %1073 = vmatpush.bf16.xpose.msrb.mxu2 %v1064_v28  ;;  %1092 = vmatpush.bf16.xpose.msrb.mxu3 %v1083_v29 }
 0x1c9   : > { %1734 = vmatmul.msk.bf16.vlgmr.msrb.gmra.mxu0 %vm1021_vm5, %v1013_v26  ;;  %1735 = vmatmul.msk.bf16.vlgmr.msrb.gmra.mxu1 %vm1021_vm5, %v1014_v27 }
 0x1ca   : > { %v816_v34 = vpop.f32.mrf.mxu2  ;;  %v846_v35 = vpop.f32.mrf.mxu3 }
 0x1cb   : > { %v893_v36 = vpop.f32.mrf.mxu0  ;;  %v923_v37 = vpop.f32.mrf.mxu1 }
 0x1cc   : > { %v1003_v38 = vadd.f32 %v1860_v30, %v893_v36  ;;  %v1004_v39 = vadd.f32 %v1861_v31, %v923_v37 }
 0x1ce   : > { %v1206_v42 = vpack.c.bf16 %v1003_v38, %v1003_v38  ;;  %v1207_v43 = vpack.c.bf16 %v1004_v39, %v1004_v39 }
 0x1cf   : > { %1736 = vmatmul.msk.bf16.vlgmr.msrb.gmra.mxu2 %vm1021_vm5, %v1015_v40  ;;  %1737 = vmatmul.msk.bf16.vlgmr.msrb.gmra.mxu3 %vm1021_vm5, %v1016_v41 }
 0x1d0   : > { %v1215_v46 = vsel %vm1213_vm6, %v1206_v42, 0  ;;  %v1234_v47 = vsel %vm1213_vm6, %v1207_v43, 0 }
 0x1d1   : > { %1224 = vmatpush.bf16.msra.mxu0 %v1215_v46  ;;  %1243 = vmatpush.bf16.msra.mxu1 %v1234_v47 }
 0x1d2   : > { %v953_v48 = vpop.f32.mrf.mxu2  ;;  %v983_v49 = vpop.f32.mrf.mxu3 }
 0x1d3   : > { %v1005_v50 = vadd.f32 %v1862_v44, %v953_v48  ;;  %v1006_v51 = vadd.f32 %v1863_v45, %v983_v49  ;;  %v895_v52 = vpop.f32.mrf.mxu0  ;;  %v925_v53 = vpop.f32.mrf.mxu1 }
 0x1d5   : > { %v1208_v54 = vpack.c.bf16 %v1005_v50, %v1005_v50  ;;  %v1209_v55 = vpack.c.bf16 %v1006_v51, %v1006_v51 }
 0x1d7   : > { %v1253_v56 = vsel %vm1213_vm6, %v1208_v54, 0  ;;  %v1272_v57 = vsel %vm1213_vm6, %v1209_v55, 0 }
 0x1d8   : > { %1262 = vmatpush.bf16.msra.mxu2 %v1253_v56  ;;  %1281 = vmatpush.bf16.msra.mxu3 %v1272_v57 }
 0x1da   : > { %v955_v58 = vpop.f32.mrf.mxu2  ;;  %v985_v59 = vpop.f32.mrf.mxu3 }
 0x246   : > { %v1037_v63 = vpop.f32.mrf.mxu0  ;;  %v1056_v1 = vpop.f32.mrf.mxu1 }
 0x247   : > { %v1098_v4 = vmul.f32 0.35355338, %v1037_v63  ;;  %v1099_v6 = vmul.f32 0.35355338, %v1056_v1 }
 0x249   : > { %v1102_v5 = vadd.f32 %v1098_v4, %v1012_v3  ;;  %v1103_v11 = vadd.f32 %v1099_v6, %v1012_v3 }
 0x24b   : > { %v1106_v7 = vsel %vm1021_vm5, %v1102_v5, -inf  ;;  %v1109_v15 = vsel %vm1021_vm5, %v1103_v11, -inf }
 0x24c   : > { %1107 = vmax.xlane.f32.xlu2 %v1106_v7 }
 0x24e   : > { %v1039_v9 = vpop.f32.mrf.mxu0  ;;  %v1058_v10 = vpop.f32.mrf.mxu1 }
 0x252   : > { %v1075_v12 = vpop.f32.mrf.mxu2  ;;  %v1094_v13 = vpop.f32.mrf.mxu3 }
 0x253   : > { %v1100_v14 = vmul.f32 0.35355338, %v1075_v12  ;;  %v1101_v17 = vmul.f32 0.35355338, %v1094_v13 }
 0x254   : > { %1110 = vmax.xlane.f32.xlu2 %v1109_v15 }
 0x255   : > { %v1104_v16 = vadd.f32 %v1100_v14, %v1012_v3  ;;  %v1105_v21 = vadd.f32 %v1101_v17, %v1012_v3 }
 0x257   : > { %v1112_v18 = vsel %vm1021_vm5, %v1104_v16, -inf  ;;  %v1115_v22 = vsel %vm1021_vm5, %v1105_v21, -inf }
 0x258   : > { %1113 = vmax.xlane.f32.xlu1 %v1112_v18 }
 0x25a   : > { %v1077_v19 = vpop.f32.mrf.mxu2  ;;  %v1096_v20 = vpop.f32.mrf.mxu3 }
 0x260   : > { %1116 = vmax.xlane.f32.xlu1 %v1115_v22 }
 0x2bf   : > { %v1108_v23 = vpop.xlane.xlu2 %1107 }
 0x2c0   : > { %v1118_v24 = vsub.f32 %v1102_v5, %v1108_v23 }
 0x2c2   : > { %v1122_v25 = vmul.f32 1.442695, %v1118_v24 }
 0x2c4   : > { %1873 = vpow2.f32 %v1122_v25 }
 0x2c7   : > { %v1111_v27 = vpop.xlane.xlu2 %1110 }
 0x2c8   : > { %v1119_v31 = vsub.f32 %v1103_v11, %v1111_v27 }
 0x2ca   : > { %v1874_v26 = vpop.eup %1873  ;;  %v1124_v33 = vmul.f32 1.442695, %v1119_v31 }
 0x2cb   : > { %v1114_v28 = vpop.xlane.xlu1 %1113  ;;  %v1130_v29 = vsel %vm1021_vm5, %v1874_v26, 0.0 }
 0x2cc   : > { %v1120_v30 = vsub.f32 %v1104_v16, %v1114_v28  ;;  %1131 = vadd.xlane.f32.xlu2 %v1130_v29 }
 0x2ce   : > { %v1126_v32 = vmul.f32 1.442695, %v1120_v30 }
 0x2d0   : > { %1875 = vpow2.f32 %v1126_v32 }
 0x2d1   : > { %1877 = vpow2.f32 %v1124_v33  ;;  %v1289_v33 = vld [vmem:[%s2369_s9] sm:$0xf] }
 0x2d3   : > { %v1117_v34 = vpop.xlane.xlu1 %1116 }
 0x2d4   : > { %v1121_v35 = vsub.f32 %v1105_v21, %v1117_v34  ;;  %v1294_v34 = vsel %vm1213_vm6, %v1289_v33, 0 }
 0x2d5   : > { %1303 = vmatpush.bf16.msrb.mxu0 %v1294_v34 }
 0x2d6   : > { %v1876_v36 = vpop.eup %1875  ;;  %v1128_v37 = vmul.f32 1.442695, %v1121_v35  ;;  %v1745_v35 = vld [vmem:[%s2369_s9 + $0x8] sm:$0xf] }
 0x2d7   : > { %v1136_v38 = vsel %vm1021_vm5, %v1876_v36, 0.0  ;;  %v2254_v39 = vpop.eup %1877 }
 0x2d8   : > { %1879 = vpow2.f32 %v1128_v37  ;;  %1137 = vadd.xlane.f32.xlu0 %v1136_v38  ;;  %v1133_v42 = vsel %vm1021_vm5, %v2254_v39, 0.0  ;;  %v1743_v37 = vld [vmem:[%s2369_s9 + $0x4] sm:$0xf] }
 0x2d9   : > { %v1320_v38 = vsel %vm1213_vm6, %v1743_v37, 0  ;;  %v1868_v37 = vld [vmem:[%s2376_s16] ss:$0 sm:$0xff] }
 0x2da   : > { %1329 = vmatpush.bf16.msrb.mxu1 %v1320_v38 }
 0x2de   : > { %v2256_v40 = vpop.eup %1879 }
 0x2df   : > { %v1139_v41 = vsel %vm1021_vm5, %v2256_v40, 0.0 }
 0x2e0   : > { %1140 = vadd.xlane.f32.xlu1 %v1139_v41  ;;  %1134 = vadd.xlane.f32.xlu0 %v1133_v42 }
 0x33f   : > { %v1132_v43 = vpop.xlane.xlu2 %1131 }
 0x340   : > { %1881 = vrcp.f32 %v1132_v43  ;;  %v1153_v47 = vand.u32 2147483648, %v1132_v43  ;;  %v1151_v49 = vand.u32 2147483647, %v1132_v43  ;;  %vm1147_vm9 = vweird.f32 %v1132_v43 }
 0x342   : > { %v1154_v52 = vor.u32 1.1754944e-38, %v1153_v47  ;;  %vm1152_vm11 = vcmp.eq.f32.partialorder %v1151_v49, 8.507059e+37 }
 0x346   : > { %v1882_v44 = vpop.eup %1881 }
 0x347   : > { %v1143_v45 = vmul.f32 %v1882_v44, %v1132_v43  ;;  %vm1148_vm8 = vweird.f32 %v1882_v44 }
 0x348   : > { %vm1149_vm10 = vmor %vm1147_vm9, %vm1148_vm8 }
 0x349   : > { %v1144_v46 = vsub.f32 1.0, %v1143_v45 }
 0x34b   : > { %v1145_v48 = vmul.f32 %v1882_v44, %v1144_v46  ;;  %v1138_v50 = vpop.xlane.xlu0 %1137 }
 0x34c   : > { %1883 = vrcp.f32 %v1138_v50  ;;  %v1183_v62 = vand.u32 2147483648, %v1138_v50  ;;  %v1181_v1 = vand.u32 2147483647, %v1138_v50  ;;  %vm1177_vm13 = vweird.f32 %v1138_v50 }
 0x34d   : > { %v1146_v51 = vadd.f32 %v1882_v44, %v1145_v48 }
 0x34e   : > { %v1184_v4 = vor.u32 1.1754944e-38, %v1183_v62  ;;  %vm1182_vm15 = vcmp.eq.f32.partialorder %v1181_v1, 8.507059e+37 }
 0x34f   : > { %v1150_v53 = vsel %vm1149_vm10, %v1882_v44, %v1146_v51 }
 0x350   : > { %v1155_v54 = vsel %vm1152_vm11, %v1154_v52, %v1150_v53 }
 0x351   : > { %v1156_v55 = vmul.f32 %v1874_v26, %v1155_v54 }
 0x352   : > { %v1884_v56 = vpop.eup %1883 }
 0x353   : > { %v1173_v57 = vmul.f32 %v1884_v56, %v1138_v50  ;;  %v1141_v58 = vpop.xlane.xlu1 %1140  ;;  %v1135_v59 = vpop.xlane.xlu0 %1134  ;;  %v1202_v60 = vpack.c.bf16 %v1156_v55, %v1156_v55  ;;  %vm1178_vm12 = vweird.f32 %v1884_v56 }
 0x354   : > { %1885 = vrcp.f32 %v1141_v58  ;;  %vm1179_vm14 = vmor %vm1177_vm13, %vm1178_vm12  ;;  %v1196_v13 = vand.u32 2147483647, %v1141_v58  ;;  %v1198_v14 = vand.u32 2147483648, %v1141_v58  ;;  %v1168_v17 = vand.u32 2147483648, %v1135_v59 }
 0x355   : > { %v1174_v61 = vsub.f32 1.0, %v1173_v57  ;;  %1887 = vrcp.f32 %v1135_v59  ;;  %1738 = vmatmul.msk.bf16.vlgmr.msra.gmra.mxu0 %vm1021_vm5, %v1202_v60  ;;  %v1166_v20 = vand.u32 2147483647, %v1135_v59  ;;  %vm1192_vm3 = vweird.f32 %v1141_v58 }
 0x356   : > { %v1199_v22 = vor.u32 1.1754944e-38, %v1198_v14  ;;  %vm1162_vm7 = vweird.f32 %v1135_v59  ;;  %vm1197_vm8 = vcmp.eq.f32.partialorder %v1196_v13, 8.507059e+37  ;;  %v1169_v25 = vor.u32 1.1754944e-38, %v1168_v17 }
 0x357   : > { %v1175_v63 = vmul.f32 %v1884_v56, %v1174_v61  ;;  %vm1167_vm10 = vcmp.eq.f32.partialorder %v1166_v20, 8.507059e+37  ;;  %vm1490_vm12 = vcmask 523264  }
 0x359   : > { %v1176_v2 = vadd.f32 %v1884_v56, %v1175_v63 }
 0x35a   : > { %v1886_v3 = vpop.eup %1885 }
 0x35b   : > { %v1888_v5 = vpop.eup %1887  ;;  %v1180_v6 = vsel %vm1179_vm14, %v1884_v56, %v1176_v2  ;;  %v1188_v7 = vmul.f32 %v1886_v3, %v1141_v58  ;;  %vm1193_vm1 = vweird.f32 %v1886_v3  ;;  %v1864_v56 = vld [vmem:[%s2370_s10] ss:$0 sm:$0xff] }
 0x35c   : > { %v1185_v9 = vsel %vm1182_vm15, %v1184_v4, %v1180_v6  ;;  %v1158_v10 = vmul.f32 %v1888_v5, %v1135_v59  ;;  %vm1163_vm2 = vweird.f32 %v1888_v5  ;;  %vm1194_vm4 = vmor %vm1192_vm3, %vm1193_vm1 }
 0x35d   : > { %v1186_v11 = vmul.f32 %v1876_v36, %v1185_v9  ;;  %v1189_v12 = vsub.f32 1.0, %v1188_v7  ;;  %vm1164_vm9 = vmor %vm1162_vm7, %vm1163_vm2  ;;  %v1343_v36 = vsel %vm1213_vm6, %v1745_v35, 0 }
 0x35e   : > { %v1159_v15 = vsub.f32 1.0, %v1158_v10  ;;  %1352 = vmatpush.bf16.msrb.mxu2 %v1343_v36 }
 0x35f   : > { %v1190_v16 = vmul.f32 %v1886_v3, %v1189_v12  ;;  %v1204_v18 = vpack.c.bf16 %v1186_v11, %v1186_v11  ;;  %v1804_v11 = vld [vmem:[%s2373_s13 + $0x8] sm:$0xff]  ;;  %v1808_v12 = vld [vmem:[%s2375_s15 + $0x18] sm:$0xff] }
 0x360   : > { %v1160_v19 = vmul.f32 %v1888_v5, %v1159_v15  ;;  %1445 = vmatpush.bf16.msra.mxu0 %v1804_v11  ;;  %v1807_v15 = vld [vmem:[%s2375_s15 + $0x10] sm:$0xff] }
 0x361   : > { %v1191_v21 = vadd.f32 %v1886_v3, %v1190_v16  ;;  %1740 = vmatmul.msk.bf16.vlgmr.msra.gmra.mxu2 %vm1021_vm5, %v1204_v18 }
 0x362   : > { %v1161_v23 = vadd.f32 %v1888_v5, %v1160_v19 }
 0x363   : > { %v1195_v24 = vsel %vm1194_vm4, %v1886_v3, %v1191_v21 }
 0x364   : > { %v1200_v26 = vsel %vm1197_vm8, %v1199_v22, %v1195_v24  ;;  %v1165_v27 = vsel %vm1164_vm9, %v1888_v5, %v1161_v23 }
 0x365   : > { %v1201_v28 = vmul.f32 %v2256_v40, %v1200_v26  ;;  %v1170_v29 = vsel %vm1167_vm10, %v1169_v25, %v1165_v27  ;;  %v1866_v25 = vld [vmem:[%s2372_s12] ss:$0 sm:$0xff] }
 0x366   : > { %v1171_v30 = vmul.f32 %v2254_v39, %v1170_v29  ;;  %v1747_v39 = vld [vmem:[%s2369_s9 + $0xc] sm:$0xf] }
 0x367   : > { %v1205_v31 = vpack.c.bf16 %v1201_v28, %v1201_v28  ;;  %v1366_v40 = vsel %vm1213_vm6, %v1747_v39, 0  ;;  %v1806_v29 = vld [vmem:[%s2375_s15 + $0x8] sm:$0xff] }
 0x368   : > { %v1203_v32 = vpack.c.bf16 %v1171_v30, %v1171_v30  ;;  %1375 = vmatpush.bf16.msrb.mxu3 %v1366_v40  ;;  %v1805_v30 = vld [vmem:[%s2375_s15] sm:$0xff] }
 0x369   : > { %1741 = vmatmul.msk.bf16.vlgmr.msra.gmra.mxu3 %vm1021_vm5, %v1205_v31  ;;  %v1867_v31 = vld [vmem:[%s2374_s14] ss:$0 sm:$0xff] }
 0x36a   : > { %1739 = vmatmul.msk.bf16.vlgmr.msra.gmra.mxu1 %vm1021_vm5, %v1203_v32 }
 0x36b   : > { %1498 = vmatpush.bf16.msra.mxu1 %v1808_v12 }
 0x36f   : > { %1499 = vmatpush.bf16.msra.mxu1 %v1807_v15 }
 0x373   : > { %1500 = vmatpush.bf16.msra.mxu1 %v1806_v29 }
 0x377   : > { %1501 = vmatpush.bf16.msra.mxu1 %v1805_v30 }
 0x3d2   : > { %v1226_v41 = vpop.f32.mrf.mxu0 }
 0x3d3   : > { %v1288_v42 = vpack.c.bf16 %v1226_v41, %v1226_v41 }
 0x3d5   : > { %1742 = vmatmul.msk.bf16.vlgmr.msrb.gmra.mxu0 %vm1021_vm5, %v1288_v42 }
 0x3da   : > { %v1228_v43 = vpop.f32.mrf.mxu0 }
 0x3e4   : > { %v1264_v44 = vpop.f32.mrf.mxu2 }
 0x3e5   : > { %v1336_v45 = vpack.c.bf16 %v1264_v44, %v1264_v44 }
 0x3e7   : > { %v1245_v46 = vpop.f32.mrf.mxu1  ;;  %1746 = vmatmul.msk.bf16.vlgmr.msrb.gmra.mxu2 %vm1021_vm5, %v1336_v45 }
 0x3e8   : > { %v1313_v47 = vpack.c.bf16 %v1245_v46, %v1245_v46 }
 0x3ea   : > { %1744 = vmatmul.msk.bf16.vlgmr.msrb.gmra.mxu1 %vm1021_vm5, %v1313_v47 }
 0x3ec   : > { %v1266_v48 = vpop.f32.mrf.mxu2  ;;  %v1283_v49 = vpop.f32.mrf.mxu3 }
 0x3ed   : > { %v1359_v50 = vpack.c.bf16 %v1283_v49, %v1283_v49 }
 0x3ef   : > { %v1247_v51 = vpop.f32.mrf.mxu1  ;;  %1748 = vmatmul.msk.bf16.vlgmr.msrb.gmra.mxu3 %vm1021_vm5, %v1359_v50 }
 0x3f4   : > { %v1285_v52 = vpop.f32.mrf.mxu3 }
 0x452   : > { %v1305_v53 = vpop.f32.mrf.mxu0 }
 0x453   : > { %v1312_v58 = vadd.f32 %v1864_v56, %v1305_v53 }
 0x45a   : > { %v1307_v54 = vpop.f32.mrf.mxu0 }
 0x467   : > { %v1331_v55 = vpop.f32.mrf.mxu1 }
 0x468   : > { %v1335_v59 = vadd.f32 %v1331_v55, %v1312_v58 }
 0x46a   : > { %v1354_v57 = vpop.f32.mrf.mxu2 }
 0x46b   : > { %v1358_v61 = vadd.f32 %v1354_v57, %v1335_v59 }
 0x46f   : > { %v1333_v60 = vpop.f32.mrf.mxu1 }
 0x472   : > { %v1356_v62 = vpop.f32.mrf.mxu2  ;;  %v1377_v63 = vpop.f32.mrf.mxu3 }
 0x473   : > { %v1381_v1 = vadd.f32 %v1377_v63, %v1358_v61 }
 0x475   : > { %v1382_v2 = vadd.f32 %v1381_v1, %v2100_v0  ;;  %v1803_v0 = vld [vmem:[%s2373_s13] sm:$0xff] }
 0x476   : > { %1446 = vmatpush.bf16.msra.mxu0 %v1803_v0 }
 0x477   : > { %v1385_v3 = vsel %vm548_vm0, %v1382_v2, 0.0 }
 0x478   : > { %1386 = vadd.xlane.f32.xlu1 %v1385_v3 }
 0x47a   : > { %v1379_v4 = vpop.f32.mrf.mxu3 }
 0x4eb   : > { %v1387_v5 = vpop.xlane.xlu1 %1386 }
 0x4ec   : > { %v1388_v6 = vmul.f32 %v1387_v5, %v2104_v8 }
 0x4ee   : > { %v1389_v7 = vsub.f32 %v1382_v2, %v1388_v6 }
 0x4f0   : > { %v1390_v9 = vmul.f32 %v1389_v7, %v1389_v7 }
 0x4f2   : > { %v1391_v10 = vsel %vm548_vm0, %v1390_v9, 0.0 }
 0x4f3   : > { %1392 = vadd.xlane.f32.xlu2 %v1391_v10 }
 0x566   : > { %v1393_v13 = vpop.xlane.xlu2 %1392 }
 0x567   : > { %v1394_v14 = vmul.f32 %v1393_v13, %v2104_v8  ;;  %v1865_v8 = vld [vmem:[%s2371_s11] ss:$0 sm:$0xff] }
 0x569   : > { %v1395_v16 = vadd.f32 1e-05, %v1394_v14 }
 0x56b   : > { %1889 = vrsqrt.f32 %v1395_v16  ;;  %vm1402_vm6 = vweird.f32 %v1395_v16 }
 0x571   : > { %v1890_v17 = vpop.eup %1889 }
 0x572   : > { %v1397_v18 = vmul.f32 %v1890_v17, %v1395_v16  ;;  %vm1403_vm5 = vweird.f32 %v1890_v17 }
 0x573   : > { %vm1404_vm11 = vmor %vm1402_vm6, %vm1403_vm5 }
 0x574   : > { %v1398_v19 = vmul.f32 %v1890_v17, %v1397_v18 }
 0x576   : > { %v1399_v20 = vmul.f32 0.5, %v1398_v19 }
 0x578   : > { %v1400_v21 = vsub.f32 1.5, %v1399_v20 }
 0x57a   : > { %v1401_v22 = vmul.f32 %v1890_v17, %v1400_v21 }
 0x57c   : > { %v1405_v23 = vsel %vm1404_vm11, %v1890_v17, %v1401_v22 }
 0x57d   : > { %v1406_v24 = vmul.f32 %v1405_v23, %v1389_v7 }
 0x57f   : > { %v1410_v26 = vmul.f32 %v1865_v8, %v1406_v24 }
 0x581   : > { %v1414_v27 = vadd.f32 %v1866_v25, %v1410_v26 }
 0x583   : > { %v1415_v28 = vpack.c.bf16 %v1414_v27, %v1414_v27 }
 0x585   : > { %1757 = vmatmul.msk.bf16.vlgmr.msra.gmra.mxu0 %vm548_vm0, %v1415_v28 }
 0x602   : > { %v1448_v32 = vpop.f32.mrf.mxu0 }
 0x603   : > { %v1449_v33 = vadd.f32 %v1867_v31, %v1448_v32 }
 0x605   : > { %v1452_v34 = vmax.f32 %v1449_v33, 0.0 }
 0x607   : > { %v1453_v35 = vpack.c.bf16 %v1452_v34, %v1452_v34 }
 0x609   : > { %1774 = vmatmul.msk.bf16.vlgmr.msra.gmra.mxu1 %vm1490_vm12, %v1453_v35 }
 0x60a   : > { %v1450_v36 = vpop.f32.mrf.mxu0 }
 0x686   : > { %v1503_v38 = vpop.f32.mrf.mxu1 }
 0x687   : > { %v1504_v39 = vadd.f32 %v1868_v37, %v1503_v38 }
 0x689   : > { %v1507_v40 = vadd.f32 %v1504_v39, %v1382_v2 }
 0x68b   : > { %1508 = vst.msk [vmem:[%s539_s29] sm:$0xff] %vm548_vm0, %v1507_v40 }
 0x68c   : > { %1918 = shalt.err (!%p1915_p3)
}
 0x68d   : > { %1809 = dma.vmem_to_hbm [thread:$0]  (%p2085_p5), %s1523_s30, 128, %s1525_s2, %s1510_s28  }
 0x68e   : > { %v1505_v41 = vpop.f32.mrf.mxu1 }
 0x68f PF: > { %p1815_p4 = scmp.ge.s32.totalorder %s1953_s27, 2  ;;  %s1536_s23 = sand.u32 1, %s1941_s24  }
 0x690   : > { %s1537_s29 = scalar_lea.sflag [#allocation3], %s1536_s23 }
 0x691   : > { %p1812_p7 = pnand %p1815_p4, %p2089_p6 }
 0x693   : > { %p1813_p8 = pneg %p1812_p7 }
 0x695   : > { %1936 = dma.done.wait (%p1813_p8), %s1537_s29, 128  }
 0x696   : > { %1938 = vsyncadd (%p1813_p8), %s1537_s29, 4294967168  ;;  %s2397_s27 = sld [smem:[#allocation6_spill]]  ;;  %s2400_s24 = smov %s1945_s25 }
 0x697   : > { %s2398_s3 = sld [smem:[#allocation5_spill]] }
 0x698   : > { %s2399_s26 = sld [smem:[#allocation7_spill]] }
 0x69c   : > { %p27_p9 = scmp.ge.s32.totalorder %s2397_s27, 4  }
 0x69d   : > { %s2401_s25 = smov %s2398_s3 }
 0x69e   :  { %29 = sbr.rel (!%p27_p9) target bundleno = 8 (0x8), region = 135 }
 0x6a3   :  { %1543 = vsyncpa [#allocation3], 1 }
 0x6a4   :  { %1545 = vsyncpa [#allocation3 + $0x1], 1 }

</bundles_post_ra>
